<compile_context>
chip_gen: v5e
topology: v5e:2x2
jax: 0.10.0
libtpu: 0.0.40
codegen_flags: <defaults>
</compile_context>

<pallas_src>
import functools

import jax
import jax.numpy as jnp
from jax.experimental import pallas as pl
from jax.experimental.pallas import tpu as pltpu


def bigru_kernel(x_ref, wih_ref, whh_ref, bih_ref, bhh_ref, wlin_ref, blin_ref,
                 out_ref, gx_ref, *, T, Bp, H, Gp, mxu_dtype):
    """Whole BiGRU forward in one kernel invocation (all operands in VMEM).

    x_ref    : (T*Bp, F)     time-major, batch-padded input (mxu_dtype)
    wih_ref  : (F, 2*Gp)     input->gate weights; per-direction 128-lane slab
                             holds tight [r|z|n] (3H lanes) + padding
    whh_ref  : (2*H, 2*Gp)   BLOCK-DIAGONAL hidden->gate weights:
                             rows 0:H x lanes 0:3H = fwd, rows H:2H x lanes
                             Gp:Gp+3H = bwd, zeros elsewhere
    bih_ref  : (1, 2*Gp)     input bias (f32, packed layout)
    bhh_ref  : (1, 2*Gp)     hidden bias (f32, packed layout)
    wlin_ref : (3*H, Op)     final linear weight, O padded to 128 lanes
    blin_ref : (1, Op)       final linear bias (f32)
    out_ref  : (Bp, Op)      logits slab (padded rows/lanes are garbage/zero)
    gx_ref   : (T*Bp, 2*Gp)  scratch: hoisted input projection (f32)
    """
    # (1) Hoisted input projection: ONE matmul for all T steps & both dirs.
    gx_ref[...] = (jnp.dot(x_ref[...], wih_ref[...],
                           preferred_element_type=jnp.float32) + bih_ref[...])

    # Hoist weight read & bias broadcast out of the unrolled loop.
    whh_bd = whh_ref[...]                                   # (2H, 2*Gp)
    bhh = jnp.broadcast_to(bhh_ref[...], (Bp, 2 * Gp))      # hoisted broadcast

    def gru_cell(gx, gh, h):
        # Tight gate slab: r at lanes 0:H, z at H:2H, n at 2H:3H.
        rz = jax.nn.sigmoid(gx[:, :2 * H] + gh[:, :2 * H])  # (Bp, 2H)
        r = rz[:, :H]
        z = rz[:, H:2 * H]
        n = jnp.tanh(gx[:, 2 * H:3 * H] + r * gh[:, 2 * H:3 * H])
        return (1.0 - z) * n + z * h                        # (Bp, H)

    h_f = jnp.zeros((Bp, H), jnp.float32)
    h_b = jnp.zeros((Bp, H), jnp.float32)

    # Incremental pooling state (bounded vreg pressure: history only for the
    # first half of the fused loop, folded away in the second half).
    f_hist = [None] * T          # f_hist[t] = fwd hidden at time t
    b_hist = [None] * T          # b_hist[t] = bwd hidden at time t
    max_pool = None
    sum_pool = None

    def fold(v, mx, sm):
        if mx is None:
            return v, v
        return jnp.maximum(mx, v), sm + v

    # (2) Fused fwd+bwd recurrence, fully unrolled (static T, static slices).
    for i in range(T):
        tf, tb = i, T - 1 - i
        # One block-diagonal matmul produces both directions' gate pre-acts.
        h_cat = jnp.concatenate([h_f, h_b], axis=1)          # (Bp, 2H)
        gh = jnp.dot(h_cat.astype(mxu_dtype), whh_bd,
                     preferred_element_type=jnp.float32) + bhh  # (Bp, 2*Gp)
        gx_f = gx_ref[tf * Bp:(tf + 1) * Bp, 0:Gp]           # vreg-aligned
        gx_b = gx_ref[tb * Bp:(tb + 1) * Bp, Gp:2 * Gp]
        h_f = gru_cell(gx_f, gh[:, :Gp], h_f)                # fwd @ time tf
        h_b = gru_cell(gx_b, gh[:, Gp:], h_b)                # bwd @ time tb

        # (3) Incremental pooling of s[t] = f[t] + b[t].
        if tf < tb:
            f_hist[tf] = h_f
            b_hist[tb] = h_b
        elif tf == tb:                                       # odd-T middle step
            max_pool, sum_pool = fold(h_f + h_b, max_pool, sum_pool)
        else:
            max_pool, sum_pool = fold(h_f + b_hist[tf], max_pool, sum_pool)
            max_pool, sum_pool = fold(f_hist[tb] + h_b, max_pool, sum_pool)
            f_hist[tb] = None                                # drop history
            b_hist[tf] = None

    last_hidden = h_f + h_b                                  # sum of final h's
    avg_pool = sum_pool * jnp.float32(1.0 / T)

    # (4) Final linear: three accumulated K=H matmuls (no lane concatenate),
    #     lane-dense (Op=128) output store.
    logits = (
        jnp.dot(last_hidden.astype(mxu_dtype), wlin_ref[0:H, :],
                preferred_element_type=jnp.float32)
        + jnp.dot(max_pool.astype(mxu_dtype), wlin_ref[H:2 * H, :],
                  preferred_element_type=jnp.float32)
        + jnp.dot(avg_pool.astype(mxu_dtype), wlin_ref[2 * H:3 * H, :],
                  preferred_element_type=jnp.float32)
        + blin_ref[...])
    out_ref[...] = logits.astype(out_ref.dtype)


def _pack_params(wih, whh, bih, bhh, wlin, blin, H, Gp, Op, mxu_dtype):
    """Re-layout PyTorch GRU/Linear params into the packed kernel layout."""
    F = wih.shape[-1]
    O = wlin.shape[0]
    G3 = 3 * H
    wih_p = jnp.zeros((F, 2 * Gp), jnp.float32)
    whh_bd = jnp.zeros((2 * H, 2 * Gp), jnp.float32)       # block-diagonal
    bih_p = jnp.zeros((1, 2 * Gp), jnp.float32)
    bhh_p = jnp.zeros((1, 2 * Gp), jnp.float32)
    for d in range(2):
        col = d * Gp
        # PyTorch gate order [r, z, n] is already the tight slab order.
        wih_p = wih_p.at[:, col:col + G3].set(wih[d].astype(jnp.float32).T)
        bih_p = bih_p.at[0, col:col + G3].set(bih[d].astype(jnp.float32))
        whh_bd = whh_bd.at[d * H:(d + 1) * H, col:col + G3].set(
            whh[d].astype(jnp.float32).T)
        bhh_p = bhh_p.at[0, col:col + G3].set(bhh[d].astype(jnp.float32))
    wlin_p = jnp.zeros((3 * H, Op), jnp.float32).at[:, :O].set(
        wlin.astype(jnp.float32).T)
    blin_p = jnp.zeros((1, Op), jnp.float32).at[0, :O].set(
        blin.astype(jnp.float32))
    return (wih_p.astype(mxu_dtype), whh_bd.astype(mxu_dtype), bih_p, bhh_p,
            wlin_p.astype(mxu_dtype), blin_p)


def bigru_forward(x, wih, whh, bih, bhh, wlin, blin, *, mxu_dtype=jnp.bfloat16):
    """x: (B, T, F) batch-first, like the PyTorch module (batch_first=True)."""
    B, T, F = x.shape
    H = whh.shape[-1]
    O = wlin.shape[0]
    Gp = ((3 * H + 127) // 128) * 128      # per-direction gate slab (>=128)
    Op = ((O + 127) // 128) * 128          # lane-dense output slab
    Bp = ((B + 7) // 8) * 8                # batch padded to full sublanes

    wih_p, whh_bd, bih_p, bhh_p, wlin_p, blin_p = _pack_params(
        wih, whh, bih, bhh, wlin, blin, H, Gp, Op, mxu_dtype)

    # Time-major, batch padded with zeros, flattened to (T*Bp, F) so the
    # hoisted input-projection matmul covers all steps & both directions.
    x_tm = jnp.zeros((T, Bp, F), jnp.float32).at[:, :B, :].set(
        jnp.transpose(x.astype(jnp.float32), (1, 0, 2)))
    x_flat = x_tm.reshape(T * Bp, F).astype(mxu_dtype)

    vmem = pl.BlockSpec(memory_space=pltpu.MemorySpace.VMEM)
    kern = functools.partial(bigru_kernel, T=T, Bp=Bp, H=H, Gp=Gp,
                             mxu_dtype=mxu_dtype)
    out = pl.pallas_call(
        kern,
        out_shape=jax.ShapeDtypeStruct((Bp, Op), jnp.float32),
        in_specs=[vmem] * 7,
        out_specs=vmem,
        scratch_shapes=[pltpu.VMEM((T * Bp, 2 * Gp), jnp.float32)],
    )(x_flat, wih_p, whh_bd, bih_p, bhh_p, wlin_p, blin_p)
    return out[:B, :O]


def bigru_reference(x, wih, whh, bih, bhh, wlin, blin):
    """Pure-JAX f32 reference mirroring the PyTorch forward (eval mode)."""
    B, T, F = x.shape
    H = whh.shape[-1]

    def run_dir(d, xs):
        h = jnp.zeros((B, H), jnp.float32)
        outs = []
        for t in range(T):
            x_t = xs[:, t]
            gx = x_t @ wih[d].T + bih[d]
            gh = h @ whh[d].T + bhh[d]
            r = jax.nn.sigmoid(gx[:, :H] + gh[:, :H])
            z = jax.nn.sigmoid(gx[:, H:2 * H] + gh[:, H:2 * H])
            n = jnp.tanh(gx[:, 2 * H:] + r * gh[:, 2 * H:])
            h = (1 - z) * n + z * h
            outs.append(h)
        return jnp.stack(outs, axis=1), h

    out_f, h_f = run_dir(0, x)
    out_b_rev, h_b = run_dir(1, x[:, ::-1])
    out_b = out_b_rev[:, ::-1]
    gsum = out_f + out_b                      # gru_out[:,:,:H] + gru_out[:,:,H:]
    last_hidden = h_f + h_b                   # sum over directions
    max_pool = jnp.max(gsum, axis=1)
    avg_pool = jnp.sum(gsum, axis=1) / float(T)
    concat = jnp.concatenate([last_hidden, max_pool, avg_pool], axis=1)
    return concat @ wlin.T + blin


if __name__ == "__main__":
    # Small shapes consistent with the module's forward.
    B, T, F, H, O = 2, 8, 4, 32, 4            # batch, seq, n_features, hidden, out

    key = jax.random.PRNGKey(0)
    ks = jax.random.split(key, 8)
    k_gru = 1.0 / jnp.sqrt(H)                 # PyTorch GRU default init bound
    k_lin = 1.0 / jnp.sqrt(3 * H)             # PyTorch Linear default init bound

    x = jax.random.normal(ks[0], (B, T, F), dtype=jnp.float32)
    wih = jax.random.uniform(ks[1], (2, 3 * H, F), minval=-k_gru, maxval=k_gru)
    whh = jax.random.uniform(ks[2], (2, 3 * H, H), minval=-k_gru, maxval=k_gru)
    bih = jax.random.uniform(ks[3], (2, 3 * H), minval=-k_gru, maxval=k_gru)
    bhh = jax.random.uniform(ks[4], (2, 3 * H), minval=-k_gru, maxval=k_gru)
    wlin = jax.random.uniform(ks[5], (O, 3 * H), minval=-k_lin, maxval=k_lin)
    blin = jax.random.uniform(ks[6], (O,), minval=-k_lin, maxval=k_lin)

    ref = bigru_reference(x, wih, whh, bih, bhh, wlin, blin)

    # Tight semantic check: f32 MXU operands.
    out_f32 = bigru_forward(x, wih, whh, bih, bhh, wlin, blin,
                            mxu_dtype=jnp.float32)
    out_f32 = jax.block_until_ready(out_f32)
    assert out_f32.shape == (B, O)
    assert jnp.allclose(out_f32, ref, atol=5e-4, rtol=5e-4), (out_f32, ref)

    # Optimized path: bf16 MXU operands (f32 accumulate, f32 gate math) —
    # looser tolerance against the f32 reference, as noted in the review.
    out_bf16 = bigru_forward(x, wih, whh, bih, bhh, wlin, blin,
                             mxu_dtype=jnp.bfloat16)
    out_bf16 = jax.block_until_ready(out_bf16)
    assert out_bf16.shape == (B, O)
    assert jnp.allclose(out_bf16, ref, atol=5e-2, rtol=5e-2), (out_bf16, ref)

    print("KERNEL_OK")
</pallas_src>

<mosaic_0001>
module attributes {stable_mosaic.version = 11 : i64} {
  func.func @bigru_kernel(%arg0: memref<64x4xf32, #tpu.memory_space<vmem>>, %arg1: memref<4x256xf32, #tpu.memory_space<vmem>>, %arg2: memref<64x256xf32, #tpu.memory_space<vmem>>, %arg3: memref<1x256xf32, #tpu.memory_space<vmem>>, %arg4: memref<1x256xf32, #tpu.memory_space<vmem>>, %arg5: memref<96x128xf32, #tpu.memory_space<vmem>>, %arg6: memref<1x128xf32, #tpu.memory_space<vmem>>, %arg7: memref<8x128xf32, #tpu.memory_space<vmem>>, %arg8: memref<64x256xf32, #tpu.memory_space<vmem>>) attributes {dimension_semantics = [], scalar_prefetch = 0 : i64, scratch_operands = 1 : i64, tpu.core_type = #tpu.core_type<tc>} {
    %c0 = arith.constant 0 : index
    %c0_0 = arith.constant 0 : index
    %0 = vector.load %arg0[%c0, %c0_0] : memref<64x4xf32, #tpu.memory_space<vmem>>, vector<64x4xf32>
    %c0_1 = arith.constant 0 : index
    %c0_2 = arith.constant 0 : index
    %1 = vector.load %arg1[%c0_1, %c0_2] : memref<4x256xf32, #tpu.memory_space<vmem>>, vector<4x256xf32>
    %cst = arith.constant dense<0.000000e+00> : vector<64x256xf32>
    %2 = tpu.matmul %0, %1, %cst {dimension_numbers = #tpu.dot_dimension_numbers<[1], [0], [0], [1], [0, 0, 1, 1], [], []>} : vector<64x4xf32>, vector<4x256xf32>, vector<64x256xf32> -> vector<64x256xf32>
    %c0_3 = arith.constant 0 : index
    %c0_4 = arith.constant 0 : index
    %3 = vector.load %arg3[%c0_3, %c0_4] : memref<1x256xf32, #tpu.memory_space<vmem>>, vector<1x256xf32>
    %4 = vector.broadcast %3 : vector<1x256xf32> to vector<64x256xf32>
    %5 = arith.addf %2, %4 : vector<64x256xf32>
    %c0_5 = arith.constant 0 : index
    %c0_6 = arith.constant 0 : index
    %6 = vector.load %arg8[%c0_5, %c0_6] : memref<64x256xf32, #tpu.memory_space<vmem>>, vector<64x256xf32>
    tpu.vector_store %arg8[%c0_5, %c0_6], %5 {strides = array<i32>} : memref<64x256xf32, #tpu.memory_space<vmem>>, vector<64x256xf32>,
    %c0_7 = arith.constant 0 : index
    %c0_8 = arith.constant 0 : index
    %7 = vector.load %arg2[%c0_7, %c0_8] : memref<64x256xf32, #tpu.memory_space<vmem>>, vector<64x256xf32>
    %c0_9 = arith.constant 0 : index
    %c0_10 = arith.constant 0 : index
    %8 = vector.load %arg4[%c0_9, %c0_10] : memref<1x256xf32, #tpu.memory_space<vmem>>, vector<1x256xf32>
    %9 = vector.shape_cast %8 : vector<1x256xf32> to vector<1x256xf32>
    %10 = vector.broadcast %9 : vector<1x256xf32> to vector<8x256xf32>
    %cst_11 = arith.constant 0.000000e+00 : f32
    %11 = vector.broadcast %cst_11 : f32 to vector<8x32xf32>
    %cst_12 = arith.constant 0.000000e+00 : f32
    %12 = vector.broadcast %cst_12 : f32 to vector<8x32xf32>
    %13 = tpu.concatenate %11, %12 in 1 : vector<8x32xf32>, vector<8x32xf32> -> vector<8x64xf32>
    %cst_13 = arith.constant dense<0.000000e+00> : vector<8x256xf32>
    %14 = tpu.matmul %13, %7, %cst_13 {dimension_numbers = #tpu.dot_dimension_numbers<[1], [0], [0], [1], [0, 0, 1, 1], [], []>} : vector<8x64xf32>, vector<64x256xf32>, vector<8x256xf32> -> vector<8x256xf32>
    %15 = arith.addf %14, %10 : vector<8x256xf32>
    %c0_14 = arith.constant 0 : index
    %c0_15 = arith.constant 0 : index
    %16 = vector.load %arg8[%c0_14, %c0_15] : memref<64x256xf32, #tpu.memory_space<vmem>>, vector<8x128xf32>
    %c56 = arith.constant 56 : index
    %c128 = arith.constant 128 : index
    %17 = vector.load %arg8[%c56, %c128] : memref<64x256xf32, #tpu.memory_space<vmem>>, vector<8x128xf32>
    %18 = vector.extract_strided_slice %15 {offsets = [0, 0], sizes = [8, 128], strides = [1, 1]} : vector<8x256xf32> to vector<8x128xf32>
    %19 = vector.extract_strided_slice %16 {offsets = [0, 0], sizes = [8, 64], strides = [1, 1]} : vector<8x128xf32> to vector<8x64xf32>
    %20 = vector.extract_strided_slice %18 {offsets = [0, 0], sizes = [8, 64], strides = [1, 1]} : vector<8x128xf32> to vector<8x64xf32>
    %21 = arith.addf %19, %20 : vector<8x64xf32>
    %22 = arith.negf %21 : vector<8x64xf32>
    %23 = math.exp %22 : vector<8x64xf32>
    %cst_16 = arith.constant 1.000000e+00 : f32
    %24 = vector.broadcast %cst_16 : f32 to vector<8x64xf32>
    %25 = arith.addf %24, %23 : vector<8x64xf32>
    %26 = arith.divf %24, %25 : vector<8x64xf32>
    %27 = vector.extract_strided_slice %26 {offsets = [0, 0], sizes = [8, 32], strides = [1, 1]} : vector<8x64xf32> to vector<8x32xf32>
    %28 = vector.extract_strided_slice %26 {offsets = [0, 32], sizes = [8, 32], strides = [1, 1]} : vector<8x64xf32> to vector<8x32xf32>
    %29 = vector.extract_strided_slice %16 {offsets = [0, 64], sizes = [8, 32], strides = [1, 1]} : vector<8x128xf32> to vector<8x32xf32>
    %30 = vector.extract_strided_slice %18 {offsets = [0, 64], sizes = [8, 32], strides = [1, 1]} : vector<8x128xf32> to vector<8x32xf32>
    %31 = arith.mulf %27, %30 : vector<8x32xf32>
    %32 = arith.addf %29, %31 : vector<8x32xf32>
    %33 = math.tanh %32 : vector<8x32xf32>
    %cst_17 = arith.constant 1.000000e+00 : f32
    %34 = vector.broadcast %cst_17 : f32 to vector<8x32xf32>
    %35 = arith.subf %34, %28 : vector<8x32xf32>
    %36 = arith.mulf %35, %33 : vector<8x32xf32>
    %37 = arith.mulf %28, %11 : vector<8x32xf32>
    %38 = arith.addf %36, %37 : vector<8x32xf32>
    %39 = vector.extract_strided_slice %15 {offsets = [0, 128], sizes = [8, 128], strides = [1, 1]} : vector<8x256xf32> to vector<8x128xf32>
    %40 = vector.extract_strided_slice %17 {offsets = [0, 0], sizes = [8, 64], strides = [1, 1]} : vector<8x128xf32> to vector<8x64xf32>
    %41 = vector.extract_strided_slice %39 {offsets = [0, 0], sizes = [8, 64], strides = [1, 1]} : vector<8x128xf32> to vector<8x64xf32>
    %42 = arith.addf %40, %41 : vector<8x64xf32>
    %43 = arith.negf %42 : vector<8x64xf32>
    %44 = math.exp %43 : vector<8x64xf32>
    %cst_18 = arith.constant 1.000000e+00 : f32
    %45 = vector.broadcast %cst_18 : f32 to vector<8x64xf32>
    %46 = arith.addf %45, %44 : vector<8x64xf32>
    %47 = arith.divf %45, %46 : vector<8x64xf32>
    %48 = vector.extract_strided_slice %47 {offsets = [0, 0], sizes = [8, 32], strides = [1, 1]} : vector<8x64xf32> to vector<8x32xf32>
    %49 = vector.extract_strided_slice %47 {offsets = [0, 32], sizes = [8, 32], strides = [1, 1]} : vector<8x64xf32> to vector<8x32xf32>
    %50 = vector.extract_strided_slice %17 {offsets = [0, 64], sizes = [8, 32], strides = [1, 1]} : vector<8x128xf32> to vector<8x32xf32>
    %51 = vector.extract_strided_slice %39 {offsets = [0, 64], sizes = [8, 32], strides = [1, 1]} : vector<8x128xf32> to vector<8x32xf32>
    %52 = arith.mulf %48, %51 : vector<8x32xf32>
    %53 = arith.addf %50, %52 : vector<8x32xf32>
    %54 = math.tanh %53 : vector<8x32xf32>
    %cst_19 = arith.constant 1.000000e+00 : f32
    %55 = vector.broadcast %cst_19 : f32 to vector<8x32xf32>
    %56 = arith.subf %55, %49 : vector<8x32xf32>
    %57 = arith.mulf %56, %54 : vector<8x32xf32>
    %58 = arith.mulf %49, %12 : vector<8x32xf32>
    %59 = arith.addf %57, %58 : vector<8x32xf32>
    %60 = tpu.concatenate %38, %59 in 1 : vector<8x32xf32>, vector<8x32xf32> -> vector<8x64xf32>
    %cst_20 = arith.constant dense<0.000000e+00> : vector<8x256xf32>
    %61 = tpu.matmul %60, %7, %cst_20 {dimension_numbers = #tpu.dot_dimension_numbers<[1], [0], [0], [1], [0, 0, 1, 1], [], []>} : vector<8x64xf32>, vector<64x256xf32>, vector<8x256xf32> -> vector<8x256xf32>
    %62 = arith.addf %61, %10 : vector<8x256xf32>
    %c8 = arith.constant 8 : index
    %c0_21 = arith.constant 0 : index
    %63 = vector.load %arg8[%c8, %c0_21] : memref<64x256xf32, #tpu.memory_space<vmem>>, vector<8x128xf32>
    %c48 = arith.constant 48 : index
    %c128_22 = arith.constant 128 : index
    %64 = vector.load %arg8[%c48, %c128_22] : memref<64x256xf32, #tpu.memory_space<vmem>>, vector<8x128xf32>
    %65 = vector.extract_strided_slice %62 {offsets = [0, 0], sizes = [8, 128], strides = [1, 1]} : vector<8x256xf32> to vector<8x128xf32>
    %66 = vector.extract_strided_slice %63 {offsets = [0, 0], sizes = [8, 64], strides = [1, 1]} : vector<8x128xf32> to vector<8x64xf32>
    %67 = vector.extract_strided_slice %65 {offsets = [0, 0], sizes = [8, 64], strides = [1, 1]} : vector<8x128xf32> to vector<8x64xf32>
    %68 = arith.addf %66, %67 : vector<8x64xf32>
    %69 = arith.negf %68 : vector<8x64xf32>
    %70 = math.exp %69 : vector<8x64xf32>
    %cst_23 = arith.constant 1.000000e+00 : f32
    %71 = vector.broadcast %cst_23 : f32 to vector<8x64xf32>
    %72 = arith.addf %71, %70 : vector<8x64xf32>
    %73 = arith.divf %71, %72 : vector<8x64xf32>
    %74 = vector.extract_strided_slice %73 {offsets = [0, 0], sizes = [8, 32], strides = [1, 1]} : vector<8x64xf32> to vector<8x32xf32>
    %75 = vector.extract_strided_slice %73 {offsets = [0, 32], sizes = [8, 32], strides = [1, 1]} : vector<8x64xf32> to vector<8x32xf32>
    %76 = vector.extract_strided_slice %63 {offsets = [0, 64], sizes = [8, 32], strides = [1, 1]} : vector<8x128xf32> to vector<8x32xf32>
    %77 = vector.extract_strided_slice %65 {offsets = [0, 64], sizes = [8, 32], strides = [1, 1]} : vector<8x128xf32> to vector<8x32xf32>
    %78 = arith.mulf %74, %77 : vector<8x32xf32>
    %79 = arith.addf %76, %78 : vector<8x32xf32>
    %80 = math.tanh %79 : vector<8x32xf32>
    %cst_24 = arith.constant 1.000000e+00 : f32
    %81 = vector.broadcast %cst_24 : f32 to vector<8x32xf32>
    %82 = arith.subf %81, %75 : vector<8x32xf32>
    %83 = arith.mulf %82, %80 : vector<8x32xf32>
    %84 = arith.mulf %75, %38 : vector<8x32xf32>
    %85 = arith.addf %83, %84 : vector<8x32xf32>
    %86 = vector.extract_strided_slice %62 {offsets = [0, 128], sizes = [8, 128], strides = [1, 1]} : vector<8x256xf32> to vector<8x128xf32>
    %87 = vector.extract_strided_slice %64 {offsets = [0, 0], sizes = [8, 64], strides = [1, 1]} : vector<8x128xf32> to vector<8x64xf32>
    %88 = vector.extract_strided_slice %86 {offsets = [0, 0], sizes = [8, 64], strides = [1, 1]} : vector<8x128xf32> to vector<8x64xf32>
    %89 = arith.addf %87, %88 : vector<8x64xf32>
    %90 = arith.negf %89 : vector<8x64xf32>
    %91 = math.exp %90 : vector<8x64xf32>
    %cst_25 = arith.constant 1.000000e+00 : f32
    %92 = vector.broadcast %cst_25 : f32 to vector<8x64xf32>
    %93 = arith.addf %92, %91 : vector<8x64xf32>
    %94 = arith.divf %92, %93 : vector<8x64xf32>
    %95 = vector.extract_strided_slice %94 {offsets = [0, 0], sizes = [8, 32], strides = [1, 1]} : vector<8x64xf32> to vector<8x32xf32>
    %96 = vector.extract_strided_slice %94 {offsets = [0, 32], sizes = [8, 32], strides = [1, 1]} : vector<8x64xf32> to vector<8x32xf32>
    %97 = vector.extract_strided_slice %64 {offsets = [0, 64], sizes = [8, 32], strides = [1, 1]} : vector<8x128xf32> to vector<8x32xf32>
    %98 = vector.extract_strided_slice %86 {offsets = [0, 64], sizes = [8, 32], strides = [1, 1]} : vector<8x128xf32> to vector<8x32xf32>
    %99 = arith.mulf %95, %98 : vector<8x32xf32>
    %100 = arith.addf %97, %99 : vector<8x32xf32>
    %101 = math.tanh %100 : vector<8x32xf32>
    %cst_26 = arith.constant 1.000000e+00 : f32
    %102 = vector.broadcast %cst_26 : f32 to vector<8x32xf32>
    %103 = arith.subf %102, %96 : vector<8x32xf32>
    %104 = arith.mulf %103, %101 : vector<8x32xf32>
    %105 = arith.mulf %96, %59 : vector<8x32xf32>
    %106 = arith.addf %104, %105 : vector<8x32xf32>
    %107 = tpu.concatenate %85, %106 in 1 : vector<8x32xf32>, vector<8x32xf32> -> vector<8x64xf32>
    %cst_27 = arith.constant dense<0.000000e+00> : vector<8x256xf32>
    %108 = tpu.matmul %107, %7, %cst_27 {dimension_numbers = #tpu.dot_dimension_numbers<[1], [0], [0], [1], [0, 0, 1, 1], [], []>} : vector<8x64xf32>, vector<64x256xf32>, vector<8x256xf32> -> vector<8x256xf32>
    %109 = arith.addf %108, %10 : vector<8x256xf32>
    %c16 = arith.constant 16 : index
    %c0_28 = arith.constant 0 : index
    %110 = vector.load %arg8[%c16, %c0_28] : memref<64x256xf32, #tpu.memory_space<vmem>>, vector<8x128xf32>
    %c40 = arith.constant 40 : index
    %c128_29 = arith.constant 128 : index
    %111 = vector.load %arg8[%c40, %c128_29] : memref<64x256xf32, #tpu.memory_space<vmem>>, vector<8x128xf32>
    %112 = vector.extract_strided_slice %109 {offsets = [0, 0], sizes = [8, 128], strides = [1, 1]} : vector<8x256xf32> to vector<8x128xf32>
    %113 = vector.extract_strided_slice %110 {offsets = [0, 0], sizes = [8, 64], strides = [1, 1]} : vector<8x128xf32> to vector<8x64xf32>
    %114 = vector.extract_strided_slice %112 {offsets = [0, 0], sizes = [8, 64], strides = [1, 1]} : vector<8x128xf32> to vector<8x64xf32>
    %115 = arith.addf %113, %114 : vector<8x64xf32>
    %116 = arith.negf %115 : vector<8x64xf32>
    %117 = math.exp %116 : vector<8x64xf32>
    %cst_30 = arith.constant 1.000000e+00 : f32
    %118 = vector.broadcast %cst_30 : f32 to vector<8x64xf32>
    %119 = arith.addf %118, %117 : vector<8x64xf32>
    %120 = arith.divf %118, %119 : vector<8x64xf32>
    %121 = vector.extract_strided_slice %120 {offsets = [0, 0], sizes = [8, 32], strides = [1, 1]} : vector<8x64xf32> to vector<8x32xf32>
    %122 = vector.extract_strided_slice %120 {offsets = [0, 32], sizes = [8, 32], strides = [1, 1]} : vector<8x64xf32> to vector<8x32xf32>
    %123 = vector.extract_strided_slice %110 {offsets = [0, 64], sizes = [8, 32], strides = [1, 1]} : vector<8x128xf32> to vector<8x32xf32>
    %124 = vector.extract_strided_slice %112 {offsets = [0, 64], sizes = [8, 32], strides = [1, 1]} : vector<8x128xf32> to vector<8x32xf32>
    %125 = arith.mulf %121, %124 : vector<8x32xf32>
    %126 = arith.addf %123, %125 : vector<8x32xf32>
    %127 = math.tanh %126 : vector<8x32xf32>
    %cst_31 = arith.constant 1.000000e+00 : f32
    %128 = vector.broadcast %cst_31 : f32 to vector<8x32xf32>
    %129 = arith.subf %128, %122 : vector<8x32xf32>
    %130 = arith.mulf %129, %127 : vector<8x32xf32>
    %131 = arith.mulf %122, %85 : vector<8x32xf32>
    %132 = arith.addf %130, %131 : vector<8x32xf32>
    %133 = vector.extract_strided_slice %109 {offsets = [0, 128], sizes = [8, 128], strides = [1, 1]} : vector<8x256xf32> to vector<8x128xf32>
    %134 = vector.extract_strided_slice %111 {offsets = [0, 0], sizes = [8, 64], strides = [1, 1]} : vector<8x128xf32> to vector<8x64xf32>
    %135 = vector.extract_strided_slice %133 {offsets = [0, 0], sizes = [8, 64], strides = [1, 1]} : vector<8x128xf32> to vector<8x64xf32>
    %136 = arith.addf %134, %135 : vector<8x64xf32>
    %137 = arith.negf %136 : vector<8x64xf32>
    %138 = math.exp %137 : vector<8x64xf32>
    %cst_32 = arith.constant 1.000000e+00 : f32
    %139 = vector.broadcast %cst_32 : f32 to vector<8x64xf32>
    %140 = arith.addf %139, %138 : vector<8x64xf32>
    %141 = arith.divf %139, %140 : vector<8x64xf32>
    %142 = vector.extract_strided_slice %141 {offsets = [0, 0], sizes = [8, 32], strides = [1, 1]} : vector<8x64xf32> to vector<8x32xf32>
    %143 = vector.extract_strided_slice %141 {offsets = [0, 32], sizes = [8, 32], strides = [1, 1]} : vector<8x64xf32> to vector<8x32xf32>
    %144 = vector.extract_strided_slice %111 {offsets = [0, 64], sizes = [8, 32], strides = [1, 1]} : vector<8x128xf32> to vector<8x32xf32>
    %145 = vector.extract_strided_slice %133 {offsets = [0, 64], sizes = [8, 32], strides = [1, 1]} : vector<8x128xf32> to vector<8x32xf32>
    %146 = arith.mulf %142, %145 : vector<8x32xf32>
    %147 = arith.addf %144, %146 : vector<8x32xf32>
    %148 = math.tanh %147 : vector<8x32xf32>
    %cst_33 = arith.constant 1.000000e+00 : f32
    %149 = vector.broadcast %cst_33 : f32 to vector<8x32xf32>
    %150 = arith.subf %149, %143 : vector<8x32xf32>
    %151 = arith.mulf %150, %148 : vector<8x32xf32>
    %152 = arith.mulf %143, %106 : vector<8x32xf32>
    %153 = arith.addf %151, %152 : vector<8x32xf32>
    %154 = tpu.concatenate %132, %153 in 1 : vector<8x32xf32>, vector<8x32xf32> -> vector<8x64xf32>
    %cst_34 = arith.constant dense<0.000000e+00> : vector<8x256xf32>
    %155 = tpu.matmul %154, %7, %cst_34 {dimension_numbers = #tpu.dot_dimension_numbers<[1], [0], [0], [1], [0, 0, 1, 1], [], []>} : vector<8x64xf32>, vector<64x256xf32>, vector<8x256xf32> -> vector<8x256xf32>
    %156 = arith.addf %155, %10 : vector<8x256xf32>
    %c24 = arith.constant 24 : index
    %c0_35 = arith.constant 0 : index
    %157 = vector.load %arg8[%c24, %c0_35] : memref<64x256xf32, #tpu.memory_space<vmem>>, vector<8x128xf32>
    %c32 = arith.constant 32 : index
    %c128_36 = arith.constant 128 : index
    %158 = vector.load %arg8[%c32, %c128_36] : memref<64x256xf32, #tpu.memory_space<vmem>>, vector<8x128xf32>
    %159 = vector.extract_strided_slice %156 {offsets = [0, 0], sizes = [8, 128], strides = [1, 1]} : vector<8x256xf32> to vector<8x128xf32>
    %160 = vector.extract_strided_slice %157 {offsets = [0, 0], sizes = [8, 64], strides = [1, 1]} : vector<8x128xf32> to vector<8x64xf32>
    %161 = vector.extract_strided_slice %159 {offsets = [0, 0], sizes = [8, 64], strides = [1, 1]} : vector<8x128xf32> to vector<8x64xf32>
    %162 = arith.addf %160, %161 : vector<8x64xf32>
    %163 = arith.negf %162 : vector<8x64xf32>
    %164 = math.exp %163 : vector<8x64xf32>
    %cst_37 = arith.constant 1.000000e+00 : f32
    %165 = vector.broadcast %cst_37 : f32 to vector<8x64xf32>
    %166 = arith.addf %165, %164 : vector<8x64xf32>
    %167 = arith.divf %165, %166 : vector<8x64xf32>
    %168 = vector.extract_strided_slice %167 {offsets = [0, 0], sizes = [8, 32], strides = [1, 1]} : vector<8x64xf32> to vector<8x32xf32>
    %169 = vector.extract_strided_slice %167 {offsets = [0, 32], sizes = [8, 32], strides = [1, 1]} : vector<8x64xf32> to vector<8x32xf32>
    %170 = vector.extract_strided_slice %157 {offsets = [0, 64], sizes = [8, 32], strides = [1, 1]} : vector<8x128xf32> to vector<8x32xf32>
    %171 = vector.extract_strided_slice %159 {offsets = [0, 64], sizes = [8, 32], strides = [1, 1]} : vector<8x128xf32> to vector<8x32xf32>
    %172 = arith.mulf %168, %171 : vector<8x32xf32>
    %173 = arith.addf %170, %172 : vector<8x32xf32>
    %174 = math.tanh %173 : vector<8x32xf32>
    %cst_38 = arith.constant 1.000000e+00 : f32
    %175 = vector.broadcast %cst_38 : f32 to vector<8x32xf32>
    %176 = arith.subf %175, %169 : vector<8x32xf32>
    %177 = arith.mulf %176, %174 : vector<8x32xf32>
    %178 = arith.mulf %169, %132 : vector<8x32xf32>
    %179 = arith.addf %177, %178 : vector<8x32xf32>
    %180 = vector.extract_strided_slice %156 {offsets = [0, 128], sizes = [8, 128], strides = [1, 1]} : vector<8x256xf32> to vector<8x128xf32>
    %181 = vector.extract_strided_slice %158 {offsets = [0, 0], sizes = [8, 64], strides = [1, 1]} : vector<8x128xf32> to vector<8x64xf32>
    %182 = vector.extract_strided_slice %180 {offsets = [0, 0], sizes = [8, 64], strides = [1, 1]} : vector<8x128xf32> to vector<8x64xf32>
    %183 = arith.addf %181, %182 : vector<8x64xf32>
    %184 = arith.negf %183 : vector<8x64xf32>
    %185 = math.exp %184 : vector<8x64xf32>
    %cst_39 = arith.constant 1.000000e+00 : f32
    %186 = vector.broadcast %cst_39 : f32 to vector<8x64xf32>
    %187 = arith.addf %186, %185 : vector<8x64xf32>
    %188 = arith.divf %186, %187 : vector<8x64xf32>
    %189 = vector.extract_strided_slice %188 {offsets = [0, 0], sizes = [8, 32], strides = [1, 1]} : vector<8x64xf32> to vector<8x32xf32>
    %190 = vector.extract_strided_slice %188 {offsets = [0, 32], sizes = [8, 32], strides = [1, 1]} : vector<8x64xf32> to vector<8x32xf32>
    %191 = vector.extract_strided_slice %158 {offsets = [0, 64], sizes = [8, 32], strides = [1, 1]} : vector<8x128xf32> to vector<8x32xf32>
    %192 = vector.extract_strided_slice %180 {offsets = [0, 64], sizes = [8, 32], strides = [1, 1]} : vector<8x128xf32> to vector<8x32xf32>
    %193 = arith.mulf %189, %192 : vector<8x32xf32>
    %194 = arith.addf %191, %193 : vector<8x32xf32>
    %195 = math.tanh %194 : vector<8x32xf32>
    %cst_40 = arith.constant 1.000000e+00 : f32
    %196 = vector.broadcast %cst_40 : f32 to vector<8x32xf32>
    %197 = arith.subf %196, %190 : vector<8x32xf32>
    %198 = arith.mulf %197, %195 : vector<8x32xf32>
    %199 = arith.mulf %190, %153 : vector<8x32xf32>
    %200 = arith.addf %198, %199 : vector<8x32xf32>
    %201 = tpu.concatenate %179, %200 in 1 : vector<8x32xf32>, vector<8x32xf32> -> vector<8x64xf32>
    %cst_41 = arith.constant dense<0.000000e+00> : vector<8x256xf32>
    %202 = tpu.matmul %201, %7, %cst_41 {dimension_numbers = #tpu.dot_dimension_numbers<[1], [0], [0], [1], [0, 0, 1, 1], [], []>} : vector<8x64xf32>, vector<64x256xf32>, vector<8x256xf32> -> vector<8x256xf32>
    %203 = arith.addf %202, %10 : vector<8x256xf32>
    %c32_42 = arith.constant 32 : index
    %c0_43 = arith.constant 0 : index
    %204 = vector.load %arg8[%c32_42, %c0_43] : memref<64x256xf32, #tpu.memory_space<vmem>>, vector<8x128xf32>
    %c24_44 = arith.constant 24 : index
    %c128_45 = arith.constant 128 : index
    %205 = vector.load %arg8[%c24_44, %c128_45] : memref<64x256xf32, #tpu.memory_space<vmem>>, vector<8x128xf32>
    %206 = vector.extract_strided_slice %203 {offsets = [0, 0], sizes = [8, 128], strides = [1, 1]} : vector<8x256xf32> to vector<8x128xf32>
    %207 = vector.extract_strided_slice %204 {offsets = [0, 0], sizes = [8, 64], strides = [1, 1]} : vector<8x128xf32> to vector<8x64xf32>
    %208 = vector.extract_strided_slice %206 {offsets = [0, 0], sizes = [8, 64], strides = [1, 1]} : vector<8x128xf32> to vector<8x64xf32>
    %209 = arith.addf %207, %208 : vector<8x64xf32>
    %210 = arith.negf %209 : vector<8x64xf32>
    %211 = math.exp %210 : vector<8x64xf32>
    %cst_46 = arith.constant 1.000000e+00 : f32
    %212 = vector.broadcast %cst_46 : f32 to vector<8x64xf32>
    %213 = arith.addf %212, %211 : vector<8x64xf32>
    %214 = arith.divf %212, %213 : vector<8x64xf32>
    %215 = vector.extract_strided_slice %214 {offsets = [0, 0], sizes = [8, 32], strides = [1, 1]} : vector<8x64xf32> to vector<8x32xf32>
    %216 = vector.extract_strided_slice %214 {offsets = [0, 32], sizes = [8, 32], strides = [1, 1]} : vector<8x64xf32> to vector<8x32xf32>
    %217 = vector.extract_strided_slice %204 {offsets = [0, 64], sizes = [8, 32], strides = [1, 1]} : vector<8x128xf32> to vector<8x32xf32>
    %218 = vector.extract_strided_slice %206 {offsets = [0, 64], sizes = [8, 32], strides = [1, 1]} : vector<8x128xf32> to vector<8x32xf32>
    %219 = arith.mulf %215, %218 : vector<8x32xf32>
    %220 = arith.addf %217, %219 : vector<8x32xf32>
    %221 = math.tanh %220 : vector<8x32xf32>
    %cst_47 = arith.constant 1.000000e+00 : f32
    %222 = vector.broadcast %cst_47 : f32 to vector<8x32xf32>
    %223 = arith.subf %222, %216 : vector<8x32xf32>
    %224 = arith.mulf %223, %221 : vector<8x32xf32>
    %225 = arith.mulf %216, %179 : vector<8x32xf32>
    %226 = arith.addf %224, %225 : vector<8x32xf32>
    %227 = vector.extract_strided_slice %203 {offsets = [0, 128], sizes = [8, 128], strides = [1, 1]} : vector<8x256xf32> to vector<8x128xf32>
    %228 = vector.extract_strided_slice %205 {offsets = [0, 0], sizes = [8, 64], strides = [1, 1]} : vector<8x128xf32> to vector<8x64xf32>
    %229 = vector.extract_strided_slice %227 {offsets = [0, 0], sizes = [8, 64], strides = [1, 1]} : vector<8x128xf32> to vector<8x64xf32>
    %230 = arith.addf %228, %229 : vector<8x64xf32>
    %231 = arith.negf %230 : vector<8x64xf32>
    %232 = math.exp %231 : vector<8x64xf32>
    %cst_48 = arith.constant 1.000000e+00 : f32
    %233 = vector.broadcast %cst_48 : f32 to vector<8x64xf32>
    %234 = arith.addf %233, %232 : vector<8x64xf32>
    %235 = arith.divf %233, %234 : vector<8x64xf32>
    %236 = vector.extract_strided_slice %235 {offsets = [0, 0], sizes = [8, 32], strides = [1, 1]} : vector<8x64xf32> to vector<8x32xf32>
    %237 = vector.extract_strided_slice %235 {offsets = [0, 32], sizes = [8, 32], strides = [1, 1]} : vector<8x64xf32> to vector<8x32xf32>
    %238 = vector.extract_strided_slice %205 {offsets = [0, 64], sizes = [8, 32], strides = [1, 1]} : vector<8x128xf32> to vector<8x32xf32>
    %239 = vector.extract_strided_slice %227 {offsets = [0, 64], sizes = [8, 32], strides = [1, 1]} : vector<8x128xf32> to vector<8x32xf32>
    %240 = arith.mulf %236, %239 : vector<8x32xf32>
    %241 = arith.addf %238, %240 : vector<8x32xf32>
    %242 = math.tanh %241 : vector<8x32xf32>
    %cst_49 = arith.constant 1.000000e+00 : f32
    %243 = vector.broadcast %cst_49 : f32 to vector<8x32xf32>
    %244 = arith.subf %243, %237 : vector<8x32xf32>
    %245 = arith.mulf %244, %242 : vector<8x32xf32>
    %246 = arith.mulf %237, %200 : vector<8x32xf32>
    %247 = arith.addf %245, %246 : vector<8x32xf32>
    %248 = arith.addf %226, %200 : vector<8x32xf32>
    %249 = arith.addf %179, %247 : vector<8x32xf32>
    %250 = arith.maximumf %248, %249 : vector<8x32xf32>
    %251 = arith.addf %248, %249 : vector<8x32xf32>
    %252 = tpu.concatenate %226, %247 in 1 : vector<8x32xf32>, vector<8x32xf32> -> vector<8x64xf32>
    %cst_50 = arith.constant dense<0.000000e+00> : vector<8x256xf32>
    %253 = tpu.matmul %252, %7, %cst_50 {dimension_numbers = #tpu.dot_dimension_numbers<[1], [0], [0], [1], [0, 0, 1, 1], [], []>} : vector<8x64xf32>, vector<64x256xf32>, vector<8x256xf32> -> vector<8x256xf32>
    %254 = arith.addf %253, %10 : vector<8x256xf32>
    %c40_51 = arith.constant 40 : index
    %c0_52 = arith.constant 0 : index
    %255 = vector.load %arg8[%c40_51, %c0_52] : memref<64x256xf32, #tpu.memory_space<vmem>>, vector<8x128xf32>
    %c16_53 = arith.constant 16 : index
    %c128_54 = arith.constant 128 : index
    %256 = vector.load %arg8[%c16_53, %c128_54] : memref<64x256xf32, #tpu.memory_space<vmem>>, vector<8x128xf32>
    %257 = vector.extract_strided_slice %254 {offsets = [0, 0], sizes = [8, 128], strides = [1, 1]} : vector<8x256xf32> to vector<8x128xf32>
    %258 = vector.extract_strided_slice %255 {offsets = [0, 0], sizes = [8, 64], strides = [1, 1]} : vector<8x128xf32> to vector<8x64xf32>
    %259 = vector.extract_strided_slice %257 {offsets = [0, 0], sizes = [8, 64], strides = [1, 1]} : vector<8x128xf32> to vector<8x64xf32>
    %260 = arith.addf %258, %259 : vector<8x64xf32>
    %261 = arith.negf %260 : vector<8x64xf32>
    %262 = math.exp %261 : vector<8x64xf32>
    %cst_55 = arith.constant 1.000000e+00 : f32
    %263 = vector.broadcast %cst_55 : f32 to vector<8x64xf32>
    %264 = arith.addf %263, %262 : vector<8x64xf32>
    %265 = arith.divf %263, %264 : vector<8x64xf32>
    %266 = vector.extract_strided_slice %265 {offsets = [0, 0], sizes = [8, 32], strides = [1, 1]} : vector<8x64xf32> to vector<8x32xf32>
    %267 = vector.extract_strided_slice %265 {offsets = [0, 32], sizes = [8, 32], strides = [1, 1]} : vector<8x64xf32> to vector<8x32xf32>
    %268 = vector.extract_strided_slice %255 {offsets = [0, 64], sizes = [8, 32], strides = [1, 1]} : vector<8x128xf32> to vector<8x32xf32>
    %269 = vector.extract_strided_slice %257 {offsets = [0, 64], sizes = [8, 32], strides = [1, 1]} : vector<8x128xf32> to vector<8x32xf32>
    %270 = arith.mulf %266, %269 : vector<8x32xf32>
    %271 = arith.addf %268, %270 : vector<8x32xf32>
    %272 = math.tanh %271 : vector<8x32xf32>
    %cst_56 = arith.constant 1.000000e+00 : f32
    %273 = vector.broadcast %cst_56 : f32 to vector<8x32xf32>
    %274 = arith.subf %273, %267 : vector<8x32xf32>
    %275 = arith.mulf %274, %272 : vector<8x32xf32>
    %276 = arith.mulf %267, %226 : vector<8x32xf32>
    %277 = arith.addf %275, %276 : vector<8x32xf32>
    %278 = vector.extract_strided_slice %254 {offsets = [0, 128], sizes = [8, 128], strides = [1, 1]} : vector<8x256xf32> to vector<8x128xf32>
    %279 = vector.extract_strided_slice %256 {offsets = [0, 0], sizes = [8, 64], strides = [1, 1]} : vector<8x128xf32> to vector<8x64xf32>
    %280 = vector.extract_strided_slice %278 {offsets = [0, 0], sizes = [8, 64], strides = [1, 1]} : vector<8x128xf32> to vector<8x64xf32>
    %281 = arith.addf %279, %280 : vector<8x64xf32>
    %282 = arith.negf %281 : vector<8x64xf32>
    %283 = math.exp %282 : vector<8x64xf32>
    %cst_57 = arith.constant 1.000000e+00 : f32
    %284 = vector.broadcast %cst_57 : f32 to vector<8x64xf32>
    %285 = arith.addf %284, %283 : vector<8x64xf32>
    %286 = arith.divf %284, %285 : vector<8x64xf32>
    %287 = vector.extract_strided_slice %286 {offsets = [0, 0], sizes = [8, 32], strides = [1, 1]} : vector<8x64xf32> to vector<8x32xf32>
    %288 = vector.extract_strided_slice %286 {offsets = [0, 32], sizes = [8, 32], strides = [1, 1]} : vector<8x64xf32> to vector<8x32xf32>
    %289 = vector.extract_strided_slice %256 {offsets = [0, 64], sizes = [8, 32], strides = [1, 1]} : vector<8x128xf32> to vector<8x32xf32>
    %290 = vector.extract_strided_slice %278 {offsets = [0, 64], sizes = [8, 32], strides = [1, 1]} : vector<8x128xf32> to vector<8x32xf32>
    %291 = arith.mulf %287, %290 : vector<8x32xf32>
    %292 = arith.addf %289, %291 : vector<8x32xf32>
    %293 = math.tanh %292 : vector<8x32xf32>
    %cst_58 = arith.constant 1.000000e+00 : f32
    %294 = vector.broadcast %cst_58 : f32 to vector<8x32xf32>
    %295 = arith.subf %294, %288 : vector<8x32xf32>
    %296 = arith.mulf %295, %293 : vector<8x32xf32>
    %297 = arith.mulf %288, %247 : vector<8x32xf32>
    %298 = arith.addf %296, %297 : vector<8x32xf32>
    %299 = arith.addf %277, %153 : vector<8x32xf32>
    %300 = arith.maximumf %250, %299 : vector<8x32xf32>
    %301 = arith.addf %251, %299 : vector<8x32xf32>
    %302 = arith.addf %132, %298 : vector<8x32xf32>
    %303 = arith.maximumf %300, %302 : vector<8x32xf32>
    %304 = arith.addf %301, %302 : vector<8x32xf32>
    %305 = tpu.concatenate %277, %298 in 1 : vector<8x32xf32>, vector<8x32xf32> -> vector<8x64xf32>
    %cst_59 = arith.constant dense<0.000000e+00> : vector<8x256xf32>
    %306 = tpu.matmul %305, %7, %cst_59 {dimension_numbers = #tpu.dot_dimension_numbers<[1], [0], [0], [1], [0, 0, 1, 1], [], []>} : vector<8x64xf32>, vector<64x256xf32>, vector<8x256xf32> -> vector<8x256xf32>
    %307 = arith.addf %306, %10 : vector<8x256xf32>
    %c48_60 = arith.constant 48 : index
    %c0_61 = arith.constant 0 : index
    %308 = vector.load %arg8[%c48_60, %c0_61] : memref<64x256xf32, #tpu.memory_space<vmem>>, vector<8x128xf32>
    %c8_62 = arith.constant 8 : index
    %c128_63 = arith.constant 128 : index
    %309 = vector.load %arg8[%c8_62, %c128_63] : memref<64x256xf32, #tpu.memory_space<vmem>>, vector<8x128xf32>
    %310 = vector.extract_strided_slice %307 {offsets = [0, 0], sizes = [8, 128], strides = [1, 1]} : vector<8x256xf32> to vector<8x128xf32>
    %311 = vector.extract_strided_slice %308 {offsets = [0, 0], sizes = [8, 64], strides = [1, 1]} : vector<8x128xf32> to vector<8x64xf32>
    %312 = vector.extract_strided_slice %310 {offsets = [0, 0], sizes = [8, 64], strides = [1, 1]} : vector<8x128xf32> to vector<8x64xf32>
    %313 = arith.addf %311, %312 : vector<8x64xf32>
    %314 = arith.negf %313 : vector<8x64xf32>
    %315 = math.exp %314 : vector<8x64xf32>
    %cst_64 = arith.constant 1.000000e+00 : f32
    %316 = vector.broadcast %cst_64 : f32 to vector<8x64xf32>
    %317 = arith.addf %316, %315 : vector<8x64xf32>
    %318 = arith.divf %316, %317 : vector<8x64xf32>
    %319 = vector.extract_strided_slice %318 {offsets = [0, 0], sizes = [8, 32], strides = [1, 1]} : vector<8x64xf32> to vector<8x32xf32>
    %320 = vector.extract_strided_slice %318 {offsets = [0, 32], sizes = [8, 32], strides = [1, 1]} : vector<8x64xf32> to vector<8x32xf32>
    %321 = vector.extract_strided_slice %308 {offsets = [0, 64], sizes = [8, 32], strides = [1, 1]} : vector<8x128xf32> to vector<8x32xf32>
    %322 = vector.extract_strided_slice %310 {offsets = [0, 64], sizes = [8, 32], strides = [1, 1]} : vector<8x128xf32> to vector<8x32xf32>
    %323 = arith.mulf %319, %322 : vector<8x32xf32>
    %324 = arith.addf %321, %323 : vector<8x32xf32>
    %325 = math.tanh %324 : vector<8x32xf32>
    %cst_65 = arith.constant 1.000000e+00 : f32
    %326 = vector.broadcast %cst_65 : f32 to vector<8x32xf32>
    %327 = arith.subf %326, %320 : vector<8x32xf32>
    %328 = arith.mulf %327, %325 : vector<8x32xf32>
    %329 = arith.mulf %320, %277 : vector<8x32xf32>
    %330 = arith.addf %328, %329 : vector<8x32xf32>
    %331 = vector.extract_strided_slice %307 {offsets = [0, 128], sizes = [8, 128], strides = [1, 1]} : vector<8x256xf32> to vector<8x128xf32>
    %332 = vector.extract_strided_slice %309 {offsets = [0, 0], sizes = [8, 64], strides = [1, 1]} : vector<8x128xf32> to vector<8x64xf32>
    %333 = vector.extract_strided_slice %331 {offsets = [0, 0], sizes = [8, 64], strides = [1, 1]} : vector<8x128xf32> to vector<8x64xf32>
    %334 = arith.addf %332, %333 : vector<8x64xf32>
    %335 = arith.negf %334 : vector<8x64xf32>
    %336 = math.exp %335 : vector<8x64xf32>
    %cst_66 = arith.constant 1.000000e+00 : f32
    %337 = vector.broadcast %cst_66 : f32 to vector<8x64xf32>
    %338 = arith.addf %337, %336 : vector<8x64xf32>
    %339 = arith.divf %337, %338 : vector<8x64xf32>
    %340 = vector.extract_strided_slice %339 {offsets = [0, 0], sizes = [8, 32], strides = [1, 1]} : vector<8x64xf32> to vector<8x32xf32>
    %341 = vector.extract_strided_slice %339 {offsets = [0, 32], sizes = [8, 32], strides = [1, 1]} : vector<8x64xf32> to vector<8x32xf32>
    %342 = vector.extract_strided_slice %309 {offsets = [0, 64], sizes = [8, 32], strides = [1, 1]} : vector<8x128xf32> to vector<8x32xf32>
    %343 = vector.extract_strided_slice %331 {offsets = [0, 64], sizes = [8, 32], strides = [1, 1]} : vector<8x128xf32> to vector<8x32xf32>
    %344 = arith.mulf %340, %343 : vector<8x32xf32>
    %345 = arith.addf %342, %344 : vector<8x32xf32>
    %346 = math.tanh %345 : vector<8x32xf32>
    %cst_67 = arith.constant 1.000000e+00 : f32
    %347 = vector.broadcast %cst_67 : f32 to vector<8x32xf32>
    %348 = arith.subf %347, %341 : vector<8x32xf32>
    %349 = arith.mulf %348, %346 : vector<8x32xf32>
    %350 = arith.mulf %341, %298 : vector<8x32xf32>
    %351 = arith.addf %349, %350 : vector<8x32xf32>
    %352 = arith.addf %330, %106 : vector<8x32xf32>
    %353 = arith.maximumf %303, %352 : vector<8x32xf32>
    %354 = arith.addf %304, %352 : vector<8x32xf32>
    %355 = arith.addf %85, %351 : vector<8x32xf32>
    %356 = arith.maximumf %353, %355 : vector<8x32xf32>
    %357 = arith.addf %354, %355 : vector<8x32xf32>
    %358 = tpu.concatenate %330, %351 in 1 : vector<8x32xf32>, vector<8x32xf32> -> vector<8x64xf32>
    %cst_68 = arith.constant dense<0.000000e+00> : vector<8x256xf32>
    %359 = tpu.matmul %358, %7, %cst_68 {dimension_numbers = #tpu.dot_dimension_numbers<[1], [0], [0], [1], [0, 0, 1, 1], [], []>} : vector<8x64xf32>, vector<64x256xf32>, vector<8x256xf32> -> vector<8x256xf32>
    %360 = arith.addf %359, %10 : vector<8x256xf32>
    %c56_69 = arith.constant 56 : index
    %c0_70 = arith.constant 0 : index
    %361 = vector.load %arg8[%c56_69, %c0_70] : memref<64x256xf32, #tpu.memory_space<vmem>>, vector<8x128xf32>
    %c0_71 = arith.constant 0 : index
    %c128_72 = arith.constant 128 : index
    %362 = vector.load %arg8[%c0_71, %c128_72] : memref<64x256xf32, #tpu.memory_space<vmem>>, vector<8x128xf32>
    %363 = vector.extract_strided_slice %360 {offsets = [0, 0], sizes = [8, 128], strides = [1, 1]} : vector<8x256xf32> to vector<8x128xf32>
    %364 = vector.extract_strided_slice %361 {offsets = [0, 0], sizes = [8, 64], strides = [1, 1]} : vector<8x128xf32> to vector<8x64xf32>
    %365 = vector.extract_strided_slice %363 {offsets = [0, 0], sizes = [8, 64], strides = [1, 1]} : vector<8x128xf32> to vector<8x64xf32>
    %366 = arith.addf %364, %365 : vector<8x64xf32>
    %367 = arith.negf %366 : vector<8x64xf32>
    %368 = math.exp %367 : vector<8x64xf32>
    %cst_73 = arith.constant 1.000000e+00 : f32
    %369 = vector.broadcast %cst_73 : f32 to vector<8x64xf32>
    %370 = arith.addf %369, %368 : vector<8x64xf32>
    %371 = arith.divf %369, %370 : vector<8x64xf32>
    %372 = vector.extract_strided_slice %371 {offsets = [0, 0], sizes = [8, 32], strides = [1, 1]} : vector<8x64xf32> to vector<8x32xf32>
    %373 = vector.extract_strided_slice %371 {offsets = [0, 32], sizes = [8, 32], strides = [1, 1]} : vector<8x64xf32> to vector<8x32xf32>
    %374 = vector.extract_strided_slice %361 {offsets = [0, 64], sizes = [8, 32], strides = [1, 1]} : vector<8x128xf32> to vector<8x32xf32>
    %375 = vector.extract_strided_slice %363 {offsets = [0, 64], sizes = [8, 32], strides = [1, 1]} : vector<8x128xf32> to vector<8x32xf32>
    %376 = arith.mulf %372, %375 : vector<8x32xf32>
    %377 = arith.addf %374, %376 : vector<8x32xf32>
    %378 = math.tanh %377 : vector<8x32xf32>
    %cst_74 = arith.constant 1.000000e+00 : f32
    %379 = vector.broadcast %cst_74 : f32 to vector<8x32xf32>
    %380 = arith.subf %379, %373 : vector<8x32xf32>
    %381 = arith.mulf %380, %378 : vector<8x32xf32>
    %382 = arith.mulf %373, %330 : vector<8x32xf32>
    %383 = arith.addf %381, %382 : vector<8x32xf32>
    %384 = vector.extract_strided_slice %360 {offsets = [0, 128], sizes = [8, 128], strides = [1, 1]} : vector<8x256xf32> to vector<8x128xf32>
    %385 = vector.extract_strided_slice %362 {offsets = [0, 0], sizes = [8, 64], strides = [1, 1]} : vector<8x128xf32> to vector<8x64xf32>
    %386 = vector.extract_strided_slice %384 {offsets = [0, 0], sizes = [8, 64], strides = [1, 1]} : vector<8x128xf32> to vector<8x64xf32>
    %387 = arith.addf %385, %386 : vector<8x64xf32>
    %388 = arith.negf %387 : vector<8x64xf32>
    %389 = math.exp %388 : vector<8x64xf32>
    %cst_75 = arith.constant 1.000000e+00 : f32
    %390 = vector.broadcast %cst_75 : f32 to vector<8x64xf32>
    %391 = arith.addf %390, %389 : vector<8x64xf32>
    %392 = arith.divf %390, %391 : vector<8x64xf32>
    %393 = vector.extract_strided_slice %392 {offsets = [0, 0], sizes = [8, 32], strides = [1, 1]} : vector<8x64xf32> to vector<8x32xf32>
    %394 = vector.extract_strided_slice %392 {offsets = [0, 32], sizes = [8, 32], strides = [1, 1]} : vector<8x64xf32> to vector<8x32xf32>
    %395 = vector.extract_strided_slice %362 {offsets = [0, 64], sizes = [8, 32], strides = [1, 1]} : vector<8x128xf32> to vector<8x32xf32>
    %396 = vector.extract_strided_slice %384 {offsets = [0, 64], sizes = [8, 32], strides = [1, 1]} : vector<8x128xf32> to vector<8x32xf32>
    %397 = arith.mulf %393, %396 : vector<8x32xf32>
    %398 = arith.addf %395, %397 : vector<8x32xf32>
    %399 = math.tanh %398 : vector<8x32xf32>
    %cst_76 = arith.constant 1.000000e+00 : f32
    %400 = vector.broadcast %cst_76 : f32 to vector<8x32xf32>
    %401 = arith.subf %400, %394 : vector<8x32xf32>
    %402 = arith.mulf %401, %399 : vector<8x32xf32>
    %403 = arith.mulf %394, %351 : vector<8x32xf32>
    %404 = arith.addf %402, %403 : vector<8x32xf32>
    %405 = arith.addf %383, %59 : vector<8x32xf32>
    %406 = arith.maximumf %356, %405 : vector<8x32xf32>
    %407 = arith.addf %357, %405 : vector<8x32xf32>
    %408 = arith.addf %38, %404 : vector<8x32xf32>
    %409 = arith.maximumf %406, %408 : vector<8x32xf32>
    %410 = arith.addf %407, %408 : vector<8x32xf32>
    %411 = arith.addf %383, %404 : vector<8x32xf32>
    %cst_77 = arith.constant 1.250000e-01 : f32
    %412 = vector.broadcast %cst_77 : f32 to vector<8x32xf32>
    %413 = arith.mulf %410, %412 : vector<8x32xf32>
    %c0_78 = arith.constant 0 : index
    %c0_79 = arith.constant 0 : index
    %414 = vector.load %arg5[%c0_78, %c0_79] : memref<96x128xf32, #tpu.memory_space<vmem>>, vector<32x128xf32>
    %cst_80 = arith.constant dense<0.000000e+00> : vector<8x128xf32>
    %415 = tpu.matmul %411, %414, %cst_80 {dimension_numbers = #tpu.dot_dimension_numbers<[1], [0], [0], [1], [0, 0, 1, 1], [], []>} : vector<8x32xf32>, vector<32x128xf32>, vector<8x128xf32> -> vector<8x128xf32>
    %c32_81 = arith.constant 32 : index
    %c0_82 = arith.constant 0 : index
    %416 = vector.load %arg5[%c32_81, %c0_82] : memref<96x128xf32, #tpu.memory_space<vmem>>, vector<32x128xf32>
    %cst_83 = arith.constant dense<0.000000e+00> : vector<8x128xf32>
    %417 = tpu.matmul %409, %416, %cst_83 {dimension_numbers = #tpu.dot_dimension_numbers<[1], [0], [0], [1], [0, 0, 1, 1], [], []>} : vector<8x32xf32>, vector<32x128xf32>, vector<8x128xf32> -> vector<8x128xf32>
    %418 = arith.addf %415, %417 : vector<8x128xf32>
    %c64 = arith.constant 64 : index
    %c0_84 = arith.constant 0 : index
    %419 = vector.load %arg5[%c64, %c0_84] : memref<96x128xf32, #tpu.memory_space<vmem>>, vector<32x128xf32>
    %cst_85 = arith.constant dense<0.000000e+00> : vector<8x128xf32>
    %420 = tpu.matmul %413, %419, %cst_85 {dimension_numbers = #tpu.dot_dimension_numbers<[1], [0], [0], [1], [0, 0, 1, 1], [], []>} : vector<8x32xf32>, vector<32x128xf32>, vector<8x128xf32> -> vector<8x128xf32>
    %421 = arith.addf %418, %420 : vector<8x128xf32>
    %c0_86 = arith.constant 0 : index
    %c0_87 = arith.constant 0 : index
    %422 = vector.load %arg6[%c0_86, %c0_87] : memref<1x128xf32, #tpu.memory_space<vmem>>, vector<1x128xf32>
    %423 = vector.broadcast %422 : vector<1x128xf32> to vector<8x128xf32>
    %424 = arith.addf %421, %423 : vector<8x128xf32>
    %c0_88 = arith.constant 0 : index
    %c0_89 = arith.constant 0 : index
    %425 = vector.load %arg7[%c0_88, %c0_89] : memref<8x128xf32, #tpu.memory_space<vmem>>, vector<8x128xf32>
    tpu.vector_store %arg7[%c0_88, %c0_89], %424 {strides = array<i32>} : memref<8x128xf32, #tpu.memory_space<vmem>>, vector<8x128xf32>,
    return
  }
}

</mosaic_0001>

<bundles_post_ra>
// kernel: tpu_custom_call.1
= control target key start
LH: loop header
LB: loop body
LE: loop exit
PB: predicated region body
PF: predicated region fallthrough
CT: control target
= control target key end

     0   :  { %12 = vsyncpa [#allocation4], 0  ;;  %s2111_s0 = inlined_call_operand.vmem [shape: f32[64,4], index: 0, kind: input, shape index: {}]   ;;  %s2112_s1 = inlined_call_operand.vmem [shape: f32[4,256], index: 1, kind: input, shape index: {}]   ;;  %s2113_s2 = inlined_call_operand.hbm [shape: f32[64,256], index: 2, kind: input, shape index: {}]   ;;  %s2114_s3 = inlined_call_operand.vmem [shape: f32[1,256], index: 3, kind: input, shape index: {}]   ;;  %s2115_s4 = inlined_call_operand.vmem [shape: f32[1,256], index: 4, kind: input, shape index: {}]   ;;  %s2116_s5 = inlined_call_operand.hbm [shape: f32[96,128], index: 5, kind: input, shape index: {}]   ;;  %s2117_s6 = inlined_call_operand.vmem [shape: f32[1,128], index: 6, kind: input, shape index: {}]   ;;  %s2118_s7 = inlined_call_operand.hbm [shape: f32[8,128], index: 7, kind: output, shape index: {}]  }
   0x1   :  { %13 = vsyncpa [#allocation7], 0 }
   0x2   :  { %14 = vsyncpa [#allocation5], 0  ;;  %s23_s26 = sshll.u32 %s2113_s2, 4  ;;  %s1621_s27 = smov [#allocation3]   ;;  %s24_s26 = int_to_ptr.hbm [resolvable:$true] %s23_s26 }
   0x3   :  { %s25_s28 = sshll.u32 %s1621_s27, 4  ;;  %s40_s8 = sshll.u32 %s2116_s5, 4  ;;  %s26_s28 = int_to_ptr.vmem [resolvable:$true] %s25_s28  ;;  %s41_s8 = int_to_ptr.hbm [resolvable:$true] %s40_s8 }
   0x4   :  { %s1622_s9 = smov 256   ;;  %s1623_s10 = smov 16  }
   0x5   :  { %31 = dma.hbm_to_vmem [thread:$0]  %s24_s26, 2048, %s26_s28, [#allocation4], %s1622_s9, %s1622_s9, %s1623_s10  }
   0x6   :  { %s1624_s11 = smov [#allocation6]   ;;  %s1625_s13 = smov 128  }
   0x7   :  { %s42_s12 = sshll.u32 %s1624_s11, 4  ;;  %s1626_s14 = smov 8   ;;  %s43_s12 = int_to_ptr.vmem [resolvable:$true] %s42_s12 }
   0x8   :  { %48 = dma.hbm_to_vmem [thread:$0]  %s41_s8, 1536, %s43_s12, [#allocation7], %s1625_s13, %s1625_s13, %s1626_s14  }
   0x9   :  { %1615 = dma.done.wait [#allocation4], 2048  }
   0xa   :  { %1616 = vsyncadd [#allocation4], 4294965248 }
   0xb   :  { %1617 = dma.done.wait [#allocation7], 1536  }
   0xc   :  { %1618 = vsyncadd [#allocation7], 4294965760  ;;  %v1677_v0 = vld [vmem:[#allocation3 + $0x70] sm:$0xff]  ;;  %v1679_v1 = vld [vmem:[#allocation3 + $0x60] sm:$0xff]  ;;  %vm103_vm0 = vcmask 1043456   ;;  %vm78_vm1 = vcmask 31744  }
   0xd   :  { %240 = vmatpush.msra.mxu2 %v1677_v0  ;;  %v1682_v2 = vld [vmem:[#allocation3 + $0x78] sm:$0xff]  ;;  %v1684_v3 = vld [vmem:[#allocation3 + $0x50] sm:$0xff]  ;;  %v1687_v4 = vld [vmem:[#allocation3 + $0x68] sm:$0xff]  ;;  %v1627_v20 = vmov 0.0   ;;  %vm356_vm10 = vcmask 261120   ;;  %vm228_vm11 = vcmask 523264  }
   0xe   :  { %260 = vmatpush.msra.mxu3 %v1682_v2  ;;  %v1690_v5 = vld [vmem:[#allocation3 + $0x58] sm:$0xff]  ;;  %v1692_v6 = vld [vmem:[#allocation3 + $0x40] sm:$0xff]  ;;  %v1699_v8 = vld [vmem:[#allocation3 + $0x48] sm:$0xff]  ;;  %s1630_s12 = smov [#allocation8]   ;;  %s1374_s5 = sshll.u32 %s2118_s7, 4  ;;  %s1375_s5 = int_to_ptr.hbm [resolvable:$true] %s1374_s5 }
   0xf   :  { %241 = vmatpush.msra.mxu2 %v1679_v1  ;;  %v67_v7 = vld [vmem:[%s2112_s1] sm:$0xff]  ;;  %v1701_v9 = vld [vmem:[#allocation3 + $0x30] sm:$0xff]  ;;  %v1707_v11 = vld [vmem:[#allocation3 + $0x20] sm:$0xff]  ;;  %s1372_s13 = sshll.u32 %s1630_s12, 4  ;;  %s1373_s13 = int_to_ptr.vmem [resolvable:$true] %s1372_s13 }
  0x10   :  { %261 = vmatpush.msra.mxu3 %v1687_v4  ;;  %75 = vst [vmem:[#allocation1] ss:$2 sm:$0xff] %v67_v7  ;;  %v1705_v10 = vld [vmem:[#allocation3 + $0x38] sm:$0xff]  ;;  %v1711_v12 = vld [vmem:[#allocation3 + $0x28] sm:$0xff]  ;;  %v1713_v13 = vld [vmem:[#allocation3 + $0x10] sm:$0xff] }
  0x11   :  { %242 = vmatpush.msra.mxu2 %v1684_v3  ;;  %v1717_v14 = vld [vmem:[#allocation3] sm:$0xff]  ;;  %v1719_v15 = vld [vmem:[#allocation3 + $0x18] sm:$0xff]  ;;  %v1726_v19 = vld [vmem:[#allocation3 + $0x8] sm:$0xff] }
  0x12   :  { %262 = vmatpush.msra.mxu3 %v1690_v5  ;;  %v59_v16 = vld [vmem:[%s2111_s0] sm:$0xff]  ;;  %v60_v21 = vld [vmem:[%s2111_s0 + $0x8] sm:$0xff]  ;;  %v61_v22 = vld [vmem:[%s2111_s0 + $0x10] sm:$0xff] }
  0x13   :  { %243 = vmatpush.msra.mxu2 %v1692_v6  ;;  %v62_v23 = vld [vmem:[%s2111_s0 + $0x18] sm:$0xff]  ;;  %v63_v24 = vld [vmem:[%s2111_s0 + $0x20] sm:$0xff]  ;;  %v64_v25 = vld [vmem:[%s2111_s0 + $0x28] sm:$0xff] }
  0x14   :  { %263 = vmatpush.msra.mxu3 %v1699_v8  ;;  %v65_v26 = vld [vmem:[%s2111_s0 + $0x30] sm:$0xff]  ;;  %v66_v27 = vld [vmem:[%s2111_s0 + $0x38] sm:$0xff]  ;;  %v68_v28 = vld [vmem:[%s2114_s3] sm:$0x3]  ;;  %s1628_s0 = smov 64   ;;  %s1629_s3 = smov 96  }
  0x15   :  { %244 = vmatpush.msra.mxu2 %v1701_v9  ;;  %v222_v29 = vld [vmem:[%s2115_s4] sm:$0x3]  ;;  %v71_v30 = vperm.slane %v68_v28, 1  ;;  %v1860_v51 = vperm.slane %v68_v28, 0 }
  0x16   :  { %264 = vmatpush.msra.mxu3 %v1705_v10  ;;  %v1840_v33 = vperm.slane %v222_v29, 0  ;;  %v1844_v36 = vperm.slane %v222_v29, 1 }
  0x17   :  { %245 = vmatpush.msra.mxu2 %v1707_v11  ;;  %v76_v17 = vld.sshfl [vmem:[#allocation1] sm:$0xff pattern:$0x75316420]  ;;  %v77_v18 = vld.sshfl [vmem:[#allocation1 + $0x8] sm:$0xff pattern:$0x75316420] }
  0x18   :  { %265 = vmatpush.msra.mxu3 %v1711_v12  ;;  %1385 = vmatpush.msk.msra.mxu0 %vm103_vm0, %v76_v17 }
  0x19   :  { %246 = vmatpush.msra.mxu2 %v1713_v13  ;;  %1386 = vmatmul.msk.f32.vlgmr.msra.gmra.mxu0 %vm78_vm1, %v59_v16 }
  0x1a   :  { %266 = vmatpush.msra.mxu3 %v1719_v15  ;;  %1394 = vmatpush.msk.msra.mxu1 %vm103_vm0, %v77_v18 }
  0x1b   :  { %247 = vmatpush.msra.mxu2 %v1717_v14  ;;  %1395 = vmatmul.msk.f32.vlgmr.msra.gmra.mxu1 %vm78_vm1, %v59_v16 }
  0x1c   :  { %248 = vmatmul.f32.vlgmr.msra.gmra.mxu2 %v1627_v20  ;;  %267 = vmatpush.msra.mxu3 %v1726_v19 }
  0x1d   :  { %268 = vmatmul.f32.vlgmr.msra.gmra.mxu3 %v1627_v20  ;;  %369 = vmatpush.msrb.mxu2 %v1677_v0 }
  0x1e   :  { %389 = vmatpush.msrb.mxu3 %v1682_v2  ;;  %753 = vmatpush.msrb.mxu0 %v1677_v0 }
  0x1f   :  { %773 = vmatpush.msrb.mxu1 %v1682_v2  ;;  %370 = vmatpush.msrb.mxu2 %v1679_v1 }
  0x20   :  { %390 = vmatpush.msrb.mxu3 %v1687_v4  ;;  %754 = vmatpush.msrb.mxu0 %v1679_v1 }
  0x21   :  { %774 = vmatpush.msrb.mxu1 %v1687_v4  ;;  %371 = vmatpush.msrb.mxu2 %v1684_v3 }
  0x22   :  { %391 = vmatpush.msrb.mxu3 %v1690_v5  ;;  %1387 = vmatmul.msk.f32.gmra.mxu0 %vm78_vm1, %v60_v21 }
  0x23   :  { %775 = vmatpush.msrb.mxu1 %v1690_v5  ;;  %372 = vmatpush.msrb.mxu2 %v1692_v6 }
  0x24   :  { %392 = vmatpush.msrb.mxu3 %v1699_v8  ;;  %1396 = vmatmul.msk.f32.gmra.mxu1 %vm78_vm1, %v60_v21 }
  0x25   :  { %755 = vmatpush.msrb.mxu0 %v1684_v3  ;;  %373 = vmatpush.msrb.mxu2 %v1701_v9 }
  0x26   :  { %393 = vmatpush.msrb.mxu3 %v1705_v10  ;;  %776 = vmatpush.msrb.mxu1 %v1699_v8 }
  0x27   :  { %756 = vmatpush.msrb.mxu0 %v1692_v6  ;;  %374 = vmatpush.msrb.mxu2 %v1707_v11 }
  0x28   :  { %394 = vmatpush.msrb.mxu3 %v1711_v12  ;;  %777 = vmatpush.msrb.mxu1 %v1705_v10 }
  0x29   :  { %757 = vmatpush.msrb.mxu0 %v1701_v9  ;;  %375 = vmatpush.msrb.mxu2 %v1713_v13 }
  0x2a   :  { %395 = vmatpush.msrb.mxu3 %v1719_v15  ;;  %1388 = vmatmul.msk.f32.gmra.mxu0 %vm78_vm1, %v61_v22 }
  0x2b   :  { %778 = vmatpush.msrb.mxu1 %v1711_v12  ;;  %376 = vmatpush.msrb.mxu2 %v1717_v14 }
  0x2c   :  { %396 = vmatpush.msrb.mxu3 %v1726_v19  ;;  %1397 = vmatmul.msk.f32.gmra.mxu1 %vm78_vm1, %v61_v22 }
  0x2d   :  { %497 = vmatpush.msra.mxu2 %v1677_v0  ;;  %758 = vmatpush.msrb.mxu0 %v1707_v11 }
  0x2e   :  { %517 = vmatpush.msra.mxu3 %v1682_v2  ;;  %779 = vmatpush.msrb.mxu1 %v1719_v15 }
  0x2f   :  { %498 = vmatpush.msra.mxu2 %v1679_v1  ;;  %759 = vmatpush.msrb.mxu0 %v1713_v13 }
  0x30   :  { %518 = vmatpush.msra.mxu3 %v1687_v4  ;;  %780 = vmatpush.msrb.mxu1 %v1726_v19 }
  0x31   :  { %499 = vmatpush.msra.mxu2 %v1684_v3  ;;  %760 = vmatpush.msrb.mxu0 %v1717_v14 }
  0x32   :  { %519 = vmatpush.msra.mxu3 %v1690_v5  ;;  %1389 = vmatmul.msk.f32.gmra.mxu0 %vm78_vm1, %v62_v23 }
  0x33   :  { %500 = vmatpush.msra.mxu2 %v1692_v6  ;;  %1019 = vmatpush.msra.mxu0 %v1677_v0 }
  0x34   :  { %520 = vmatpush.msra.mxu3 %v1699_v8  ;;  %1398 = vmatmul.msk.f32.gmra.mxu1 %vm78_vm1, %v62_v23 }
  0x35   :  { %501 = vmatpush.msra.mxu2 %v1701_v9  ;;  %1039 = vmatpush.msra.mxu1 %v1682_v2 }
  0x36   :  { %521 = vmatpush.msra.mxu3 %v1705_v10  ;;  %1020 = vmatpush.msra.mxu0 %v1679_v1 }
  0x37   :  { %502 = vmatpush.msra.mxu2 %v1707_v11  ;;  %1040 = vmatpush.msra.mxu1 %v1687_v4 }
  0x38   :  { %522 = vmatpush.msra.mxu3 %v1711_v12  ;;  %1021 = vmatpush.msra.mxu0 %v1684_v3 }
  0x39   :  { %503 = vmatpush.msra.mxu2 %v1713_v13  ;;  %1041 = vmatpush.msra.mxu1 %v1690_v5 }
  0x3a   :  { %523 = vmatpush.msra.mxu3 %v1719_v15  ;;  %1390 = vmatmul.msk.f32.gmra.mxu0 %vm78_vm1, %v63_v24 }
  0x3b   :  { %504 = vmatpush.msra.mxu2 %v1717_v14  ;;  %1022 = vmatpush.msra.mxu0 %v1692_v6 }
  0x3c   :  { %524 = vmatpush.msra.mxu3 %v1726_v19  ;;  %1399 = vmatmul.msk.f32.gmra.mxu1 %vm78_vm1, %v63_v24 }
  0x3d   :  { %1042 = vmatpush.msra.mxu1 %v1699_v8  ;;  %1023 = vmatpush.msra.mxu0 %v1701_v9 }
  0x3f   :  { %1043 = vmatpush.msra.mxu1 %v1705_v10  ;;  %1024 = vmatpush.msra.mxu0 %v1707_v11 }
  0x41   :  { %1044 = vmatpush.msra.mxu1 %v1711_v12  ;;  %1025 = vmatpush.msra.mxu0 %v1713_v13 }
  0x42   :  { %1391 = vmatmul.msk.f32.gmra.mxu0 %vm78_vm1, %v64_v25 }
  0x43   :  { %1045 = vmatpush.msra.mxu1 %v1719_v15  ;;  %1026 = vmatpush.msra.mxu0 %v1717_v14 }
  0x44   :  { %1400 = vmatmul.msk.f32.gmra.mxu1 %vm78_vm1, %v64_v25 }
  0x45   :  { %1046 = vmatpush.msra.mxu1 %v1726_v19 }
  0x4a   :  { %1392 = vmatmul.msk.f32.gmra.mxu0 %vm78_vm1, %v65_v26 }
  0x4c   :  { %1401 = vmatmul.msk.f32.gmra.mxu1 %vm78_vm1, %v65_v26 }
  0x52   :  { %1393 = vmatmul.msk.f32.gmra.mxu0 %vm78_vm1, %v66_v27 }
  0x54   :  { %1402 = vmatmul.msk.f32.gmra.mxu1 %vm78_vm1, %v66_v27 }
  0x96   :  { %v125_v52 = vpop.f32.mrf.mxu0 }
  0x97   :  { %v126_v53 = vadd.f32 %v125_v52, %v1860_v51 }
  0x98   :  { %v166_v31 = vpop.f32.mrf.mxu1 }
  0x99   :  { %v1838_v32 = vadd.f32 %v166_v31, %v71_v30 }
  0x9f   :  { %v249_v34 = vpop.f32.mrf.mxu2 }
  0xa0   :  { %v250_v35 = vadd.f32 %v249_v34, %v1840_v33  ;;  %v269_v38 = vpop.f32.mrf.mxu3 }
  0xa1   :  { %v169_v37 = vpop.f32.mrf.mxu1  ;;  %v270_v40 = vadd.f32 %v269_v38, %v1844_v36 }
  0xa2   :  { %295 = vrot.lane.b32.xlu0 %v250_v35, %s1628_s0  ;;  %v1846_v39 = vadd.f32 %v169_v37, %v71_v30  ;;  %v274_v55 = vadd.f32 %v250_v35, %v126_v53 }
  0xa4   :  { %v1403_v57 = vmul.f32 -1.442695, %v274_v55 }
  0xa6   :  { %1447 = vpow2.f32 %v1403_v57 }
  0xa9   :  { %v172_v41 = vpop.f32.mrf.mxu1 }
  0xaa   :  { %334 = vrot.lane.b32.xlu0 %v270_v40, %s1628_s0  ;;  %v1850_v42 = vadd.f32 %v172_v41, %v71_v30 }
  0xac   :  { %v1448_v60 = vpop.eup %1447 }
  0xad   :  { %v278_v61 = vadd.f32 1.0, %v1448_v60 }
  0xaf   :  { %v290_v24 = vand.u32 2147483648, %v278_v61  ;;  %vm284_vm3 = vweird.f32 %v278_v61  ;;  %v288_v25 = vand.u32 2147483647, %v278_v61 }
  0xb1   :  { %v175_v43 = vpop.f32.mrf.mxu1  ;;  %v291_v28 = vor.u32 1.1754944e-38, %v290_v24  ;;  %vm289_vm7 = vcmp.eq.f32.partialorder %v288_v25, 8.507059e+37 }
  0xb2   :  { %v1852_v44 = vadd.f32 %v175_v43, %v71_v30 }
  0xb9   :  { %v178_v45 = vpop.f32.mrf.mxu1 }
  0xba   :  { %v1854_v46 = vadd.f32 %v178_v45, %v71_v30 }
  0xc1   :  { %v181_v47 = vpop.f32.mrf.mxu1 }
  0xc2   :  { %v1856_v48 = vadd.f32 %v181_v47, %v71_v30 }
  0xc9   :  { %v184_v49 = vpop.f32.mrf.mxu1 }
  0xca   :  { %v1858_v50 = vadd.f32 %v184_v49, %v71_v30 }
  0xd1   :  { %v187_v54 = vpop.f32.mrf.mxu1 }
  0xd2   :  { %v188_v56 = vadd.f32 %v187_v54, %v71_v30 }
  0xd4   :  { %v313_v58 = vadd.f32 %v270_v40, %v188_v56 }
  0xd6   :  { %v1404_v59 = vmul.f32 -1.442695, %v313_v58 }
  0xd8   :  { %1449 = vpow2.f32 %v1404_v59 }
  0xd9   :  { %1451 = vrcp.f32 %v278_v61 }
  0xde   :  { %v1450_v62 = vpop.eup %1449 }
  0xdf   :  { %v317_v63 = vadd.f32 1.0, %v1450_v62  ;;  %v1452_v7 = vpop.eup %1451 }
  0xe0   :  { %v280_v16 = vmul.f32 %v1452_v7, %v278_v61  ;;  %vm285_vm2 = vweird.f32 %v1452_v7 }
  0xe1   :  { %1453 = vrcp.f32 %v317_v63  ;;  %vm286_vm4 = vmor %vm284_vm3, %vm285_vm2  ;;  %vm323_vm5 = vweird.f32 %v317_v63  ;;  %v329_v29 = vand.u32 2147483648, %v317_v63  ;;  %v327_v31 = vand.u32 2147483647, %v317_v63 }
  0xe2   :  { %v281_v18 = vsub.f32 1.0, %v280_v16 }
  0xe3   :  { %v330_v38 = vor.u32 1.1754944e-38, %v329_v29  ;;  %vm328_vm9 = vcmp.eq.f32.partialorder %v327_v31, 8.507059e+37 }
  0xe4   :  { %v282_v21 = vmul.f32 %v1452_v7, %v281_v18 }
  0xe6   :  { %v283_v23 = vadd.f32 %v1452_v7, %v282_v21 }
  0xe7   :  { %v1454_v17 = vpop.eup %1453 }
  0xe8   :  { %v319_v20 = vmul.f32 %v1454_v17, %v317_v63  ;;  %v287_v27 = vsel %vm286_vm4, %v1452_v7, %v283_v23  ;;  %vm324_vm6 = vweird.f32 %v1454_v17 }
  0xe9   :  { %v292_v35 = vsel %vm289_vm7, %v291_v28, %v287_v27  ;;  %vm325_vm8 = vmor %vm323_vm5, %vm324_vm6  ;;  %v128_v27 = vpop.f32.mrf.mxu0 }
  0xea   :  { %v320_v22 = vsub.f32 1.0, %v319_v20  ;;  %v305_v58 = vsub.f32 1.0, %v292_v35  ;;  %v311_v60 = vmul.f32 0.0, %v292_v35  ;;  %v129_v29 = vadd.f32 %v128_v27, %v1860_v51 }
  0xec   :  { %v321_v26 = vmul.f32 %v1454_v17, %v320_v22 }
  0xee   :  { %v322_v30 = vadd.f32 %v1454_v17, %v321_v26 }
  0xf0   :  { %v326_v40 = vsel %vm325_vm8, %v1454_v17, %v322_v30 }
  0xf1   :  { %v331_v41 = vsel %vm328_vm9, %v330_v38, %v326_v40 }
  0xf2   :  { %v344_v63 = vsub.f32 1.0, %v331_v41 }
 0x114   :  { %v296_v34 = vpop.permute.xlu0 %295 }
 0x115   :  { %v298_v37 = vmul.f32 %v296_v34, %v292_v35 }
 0x117   :  { %300 = vrot.lane.b32.xlu1 %v298_v37, %s1628_s0 }
 0x11c   :  { %v335_v43 = vpop.permute.xlu0 %334 }
 0x11d   :  { %v337_v45 = vmul.f32 %v335_v43, %v331_v41 }
 0x11f   :  { %339 = vrot.lane.b32.xlu1 %v337_v45, %s1628_s0 }
 0x189   :  { %v301_v47 = vpop.permute.xlu1 %300 }
 0x18a   :  { %v303_v49 = vadd.f32 %v301_v47, %v126_v53 }
 0x18c   :  { %1455 = vtanh.f32 %v303_v49 }
 0x191   :  { %v340_v52 = vpop.permute.xlu1 %339 }
 0x192   :  { %v1456_v54 = vpop.eup %1455  ;;  %v342_v55 = vadd.f32 %v340_v52, %v188_v56  ;;  %v350_v56 = vmul.f32 0.0, %v331_v41 }
 0x193   :  { %307 = vrot.lane.b32.xlu2 %v1456_v54, %s1629_s3 }
 0x194   :  { %1457 = vtanh.f32 %v342_v55 }
 0x19a   :  { %v1458_v57 = vpop.eup %1457 }
 0x19b   :  { %346 = vrot.lane.b32.xlu2 %v1458_v57, %s1629_s3 }
 0x1ed   :  { %v308_v59 = vpop.permute.xlu2 %307 }
 0x1ee   :  { %v310_v61 = vmul.f32 %v308_v59, %v305_v58 }
 0x1f0   :  { %v1867_v62 = vadd.f32 %v311_v60, %v310_v61 }
 0x1f2   :  { %353 = vrot.lane.b32.xlu0 %v1867_v62, %s1629_s3 }
 0x1f5   :  { %v347_v53 = vpop.permute.xlu2 %346 }
 0x1f6   :  { %v349_v7 = vmul.f32 %v347_v53, %v344_v63 }
 0x1f8   :  { %v1871_v16 = vadd.f32 %v350_v56, %v349_v7 }
 0x264   :  { %v354_v17 = vpop.permute.xlu0 %353 }
 0x265   :  { %v357_v18 = vsel %vm356_vm10, %v354_v17, %v1871_v16 }
 0x266   :  { %1405 = vmatmul.msk.f32.vlgmr.msrb.gmra.mxu2 %vm228_vm11, %v357_v18  ;;  %1406 = vmatmul.msk.f32.vlgmr.msrb.gmra.mxu3 %vm228_vm11, %v357_v18 }
 0x267   :  { %625 = vmatpush.msrb.mxu2 %v1677_v0  ;;  %645 = vmatpush.msrb.mxu3 %v1682_v2 }
 0x269   :  { %626 = vmatpush.msrb.mxu2 %v1679_v1  ;;  %646 = vmatpush.msrb.mxu3 %v1687_v4 }
 0x26b   :  { %627 = vmatpush.msrb.mxu2 %v1684_v3  ;;  %647 = vmatpush.msrb.mxu3 %v1690_v5 }
 0x26d   :  { %628 = vmatpush.msrb.mxu2 %v1692_v6  ;;  %648 = vmatpush.msrb.mxu3 %v1699_v8 }
 0x26f   :  { %629 = vmatpush.msrb.mxu2 %v1701_v9  ;;  %649 = vmatpush.msrb.mxu3 %v1705_v10 }
 0x271   :  { %630 = vmatpush.msrb.mxu2 %v1707_v11  ;;  %650 = vmatpush.msrb.mxu3 %v1711_v12 }
 0x273   :  { %631 = vmatpush.msrb.mxu2 %v1713_v13  ;;  %651 = vmatpush.msrb.mxu3 %v1719_v15 }
 0x275   :  { %632 = vmatpush.msrb.mxu2 %v1717_v14  ;;  %652 = vmatpush.msrb.mxu3 %v1726_v19 }
 0x2e9   :  { %v378_v20 = vpop.f32.mrf.mxu2  ;;  %v398_v21 = vpop.f32.mrf.mxu3 }
 0x2ea   :  { %v379_v22 = vadd.f32 %v378_v20, %v1840_v33  ;;  %v399_v23 = vadd.f32 %v398_v21, %v1844_v36 }
 0x2ec   :  { %463 = vrot.lane.b32.xlu2 %v399_v23, %s1628_s0  ;;  %424 = vrot.lane.b32.xlu1 %v379_v22, %s1628_s0  ;;  %v442_v24 = vadd.f32 %v399_v23, %v1858_v50  ;;  %v403_v30 = vadd.f32 %v379_v22, %v129_v29 }
 0x2ee   :  { %v1408_v25 = vmul.f32 -1.442695, %v442_v24  ;;  %v1407_v34 = vmul.f32 -1.442695, %v403_v30 }
 0x2f0   :  { %1459 = vpow2.f32 %v1408_v25 }
 0x2f6   :  { %v1460_v26 = vpop.eup %1459 }
 0x2f7   :  { %v446_v28 = vadd.f32 1.0, %v1460_v26 }
 0x2f9   :  { %1461 = vrcp.f32 %v446_v28  ;;  %v458_v45 = vand.u32 2147483648, %v446_v28  ;;  %vm452_vm13 = vweird.f32 %v446_v28  ;;  %v456_v47 = vand.u32 2147483647, %v446_v28 }
 0x2fa   :  { %1463 = vpow2.f32 %v1407_v34 }
 0x2fb   :  { %v459_v52 = vor.u32 1.1754944e-38, %v458_v45  ;;  %vm457_vm15 = vcmp.eq.f32.partialorder %v456_v47, 8.507059e+37 }
 0x2ff   :  { %v1462_v31 = vpop.eup %1461 }
 0x300   :  { %v448_v35 = vmul.f32 %v1462_v31, %v446_v28  ;;  %v1464_v38 = vpop.eup %1463  ;;  %vm453_vm12 = vweird.f32 %v1462_v31 }
 0x301   :  { %v407_v41 = vadd.f32 1.0, %v1464_v38  ;;  %vm454_vm14 = vmor %vm452_vm13, %vm453_vm12 }
 0x302   :  { %v449_v37 = vsub.f32 1.0, %v448_v35 }
 0x303   :  { %1465 = vrcp.f32 %v407_v41  ;;  %v419_v63 = vand.u32 2147483648, %v407_v41  ;;  %vm413_vm1 = vweird.f32 %v407_v41  ;;  %v417_v7 = vand.u32 2147483647, %v407_v41 }
 0x304   :  { %v450_v40 = vmul.f32 %v1462_v31, %v449_v37 }
 0x305   :  { %v420_v17 = vor.u32 1.1754944e-38, %v419_v63  ;;  %vm418_vm3 = vcmp.eq.f32.partialorder %v417_v7, 8.507059e+37 }
 0x306   :  { %v451_v43 = vadd.f32 %v1462_v31, %v450_v40 }
 0x308   :  { %v455_v49 = vsel %vm454_vm14, %v1462_v31, %v451_v43 }
 0x309   :  { %v460_v55 = vsel %vm457_vm15, %v459_v52, %v455_v49  ;;  %v1466_v58 = vpop.eup %1465 }
 0x30a   :  { %v409_v59 = vmul.f32 %v1466_v58, %v407_v41  ;;  %vm414_vm0 = vweird.f32 %v1466_v58  ;;  %v473_v37 = vsub.f32 1.0, %v460_v55  ;;  %v479_v40 = vmul.f32 %v460_v55, %v1871_v16 }
 0x30b   :  { %vm415_vm2 = vmor %vm413_vm1, %vm414_vm0 }
 0x30c   :  { %v410_v60 = vsub.f32 1.0, %v409_v59 }
 0x30e   :  { %v411_v61 = vmul.f32 %v1466_v58, %v410_v60 }
 0x310   :  { %v412_v53 = vadd.f32 %v1466_v58, %v411_v61 }
 0x312   :  { %v416_v56 = vsel %vm415_vm2, %v1466_v58, %v412_v53 }
 0x313   :  { %v421_v20 = vsel %vm418_vm3, %v420_v17, %v416_v56 }
 0x314   :  { %v434_v28 = vsub.f32 1.0, %v421_v20  ;;  %v440_v31 = vmul.f32 %v421_v20, %v1867_v62 }
 0x346   :  { %v464_v54 = vpop.permute.xlu2 %463 }
 0x347   :  { %v466_v57 = vmul.f32 %v464_v54, %v460_v55  ;;  %v131_v54 = vpop.f32.mrf.mxu0 }
 0x348   :  { %v132_v55 = vadd.f32 %v131_v54, %v1860_v51 }
 0x349   :  { %468 = vrot.lane.b32.xlu1 %v466_v57, %s1628_s0 }
 0x35e   :  { %v425_v18 = vpop.permute.xlu1 %424 }
 0x35f   :  { %v427_v21 = vmul.f32 %v425_v18, %v421_v20 }
 0x361   :  { %429 = vrot.lane.b32.xlu0 %v427_v21, %s1628_s0 }
 0x3bb   :  { %v469_v22 = vpop.permute.xlu1 %468 }
 0x3bc   :  { %v471_v23 = vadd.f32 %v469_v22, %v1858_v50 }
 0x3be   :  { %1467 = vtanh.f32 %v471_v23 }
 0x3c4   :  { %v1468_v24 = vpop.eup %1467 }
 0x3c5   :  { %475 = vrot.lane.b32.xlu0 %v1468_v24, %s1629_s3 }
 0x3d3   :  { %v430_v25 = vpop.permute.xlu0 %429 }
 0x3d4   :  { %v432_v26 = vadd.f32 %v430_v25, %v129_v29 }
 0x3d6   :  { %1469 = vtanh.f32 %v432_v26 }
 0x3dc   :  { %v1470_v27 = vpop.eup %1469 }
 0x3dd   :  { %436 = vrot.lane.b32.xlu2 %v1470_v27, %s1629_s3 }
 0x437   :  { %v437_v30 = vpop.permute.xlu2 %436  ;;  %v476_v50 = vpop.permute.xlu0 %475 }
 0x438   :  { %v439_v34 = vmul.f32 %v437_v30, %v434_v28  ;;  %v478_v38 = vmul.f32 %v476_v50, %v473_v37 }
 0x43a   :  { %v1905_v35 = vadd.f32 %v440_v31, %v439_v34  ;;  %v1910_v29 = vadd.f32 %v479_v40, %v478_v38 }
 0x43c   :  { %482 = vrot.lane.b32.xlu1 %v1905_v35, %s1629_s3 }
 0x4ae   :  { %v483_v41 = vpop.permute.xlu1 %482 }
 0x4af   :  { %v485_v43 = vsel %vm356_vm10, %v483_v41, %v1910_v29 }
 0x4b0   :  { %1409 = vmatmul.msk.f32.vlgmr.msra.gmra.mxu2 %vm228_vm11, %v485_v43  ;;  %1410 = vmatmul.msk.f32.vlgmr.msra.gmra.mxu3 %vm228_vm11, %v485_v43 }
 0x4b1   :  { %885 = vmatpush.msra.mxu2 %v1677_v0  ;;  %905 = vmatpush.msra.mxu3 %v1682_v2 }
 0x4b3   :  { %886 = vmatpush.msra.mxu2 %v1679_v1  ;;  %906 = vmatpush.msra.mxu3 %v1687_v4 }
 0x4b5   :  { %887 = vmatpush.msra.mxu2 %v1684_v3  ;;  %907 = vmatpush.msra.mxu3 %v1690_v5 }
 0x4b7   :  { %888 = vmatpush.msra.mxu2 %v1692_v6  ;;  %908 = vmatpush.msra.mxu3 %v1699_v8 }
 0x4b9   :  { %889 = vmatpush.msra.mxu2 %v1701_v9  ;;  %909 = vmatpush.msra.mxu3 %v1705_v10 }
 0x4bb   :  { %890 = vmatpush.msra.mxu2 %v1707_v11  ;;  %910 = vmatpush.msra.mxu3 %v1711_v12 }
 0x4bd   :  { %891 = vmatpush.msra.mxu2 %v1713_v13  ;;  %911 = vmatpush.msra.mxu3 %v1719_v15 }
 0x4bf   :  { %892 = vmatpush.msra.mxu2 %v1717_v14  ;;  %912 = vmatpush.msra.mxu3 %v1726_v19 }
 0x533   :  { %v506_v45 = vpop.f32.mrf.mxu2  ;;  %v526_v47 = vpop.f32.mrf.mxu3 }
 0x534   :  { %v507_v49 = vadd.f32 %v506_v45, %v1840_v33  ;;  %v527_v52 = vadd.f32 %v526_v47, %v1844_v36 }
 0x536   :  { %591 = vrot.lane.b32.xlu0 %v527_v52, %s1628_s0  ;;  %552 = vrot.lane.b32.xlu2 %v507_v49, %s1628_s0  ;;  %v531_v57 = vadd.f32 %v507_v49, %v132_v55  ;;  %v570_v61 = vadd.f32 %v527_v52, %v1856_v48 }
 0x538   :  { %v1411_v58 = vmul.f32 -1.442695, %v531_v57  ;;  %v1412_v63 = vmul.f32 -1.442695, %v570_v61 }
 0x53a   :  { %1471 = vpow2.f32 %v1411_v58 }
 0x540   :  { %v1472_v59 = vpop.eup %1471 }
 0x541   :  { %v535_v60 = vadd.f32 1.0, %v1472_v59 }
 0x543   :  { %1473 = vrcp.f32 %v535_v60  ;;  %v547_v22 = vand.u32 2147483648, %v535_v60  ;;  %vm541_vm5 = vweird.f32 %v535_v60  ;;  %v545_v23 = vand.u32 2147483647, %v535_v60 }
 0x544   :  { %1475 = vpow2.f32 %v1412_v63 }
 0x545   :  { %v548_v25 = vor.u32 1.1754944e-38, %v547_v22  ;;  %vm546_vm7 = vcmp.eq.f32.partialorder %v545_v23, 8.507059e+37 }
 0x549   :  { %v1474_v53 = vpop.eup %1473 }
 0x54a   :  { %v537_v7 = vmul.f32 %v1474_v53, %v535_v60  ;;  %v1476_v17 = vpop.eup %1475  ;;  %vm542_vm4 = vweird.f32 %v1474_v53 }
 0x54b   :  { %v574_v20 = vadd.f32 1.0, %v1476_v17  ;;  %vm543_vm6 = vmor %vm541_vm5, %vm542_vm4 }
 0x54c   :  { %v538_v56 = vsub.f32 1.0, %v537_v7 }
 0x54d   :  { %1477 = vrcp.f32 %v574_v20  ;;  %v586_v38 = vand.u32 2147483648, %v574_v20  ;;  %vm580_vm9 = vweird.f32 %v574_v20  ;;  %v584_v40 = vand.u32 2147483647, %v574_v20 }
 0x54e   :  { %v539_v18 = vmul.f32 %v1474_v53, %v538_v56 }
 0x54f   :  { %v587_v43 = vor.u32 1.1754944e-38, %v586_v38  ;;  %vm585_vm13 = vcmp.eq.f32.partialorder %v584_v40, 8.507059e+37 }
 0x550   :  { %v540_v21 = vadd.f32 %v1474_v53, %v539_v18 }
 0x552   :  { %v544_v24 = vsel %vm543_vm6, %v1474_v53, %v540_v21 }
 0x553   :  { %v549_v27 = vsel %vm546_vm7, %v548_v25, %v544_v24  ;;  %v1478_v30 = vpop.eup %1477 }
 0x554   :  { %v576_v31 = vmul.f32 %v1478_v30, %v574_v20  ;;  %vm581_vm8 = vweird.f32 %v1478_v30  ;;  %v562_v61 = vsub.f32 1.0, %v549_v27  ;;  %v568_v63 = vmul.f32 %v549_v27, %v1905_v35 }
 0x555   :  { %vm582_vm12 = vmor %vm580_vm9, %vm581_vm8 }
 0x556   :  { %v577_v34 = vsub.f32 1.0, %v576_v31 }
 0x558   :  { %v578_v50 = vmul.f32 %v1478_v30, %v577_v34 }
 0x55a   :  { %v579_v37 = vadd.f32 %v1478_v30, %v578_v50 }
 0x55c   :  { %v583_v41 = vsel %vm582_vm12, %v1478_v30, %v579_v37 }
 0x55d   :  { %v588_v47 = vsel %vm585_vm13, %v587_v43, %v583_v41 }
 0x55e   :  { %v607_v18 = vmul.f32 %v588_v47, %v1910_v29 }
 0x590   :  { %v553_v26 = vpop.permute.xlu2 %552 }
 0x591   :  { %v555_v28 = vmul.f32 %v553_v26, %v549_v27 }
 0x593   :  { %557 = vrot.lane.b32.xlu1 %v555_v28, %s1628_s0 }
 0x5a8   :  { %v592_v45 = vpop.permute.xlu0 %591 }
 0x5a9   :  { %v594_v49 = vmul.f32 %v592_v45, %v588_v47 }
 0x5ab   :  { %596 = vrot.lane.b32.xlu2 %v594_v49, %s1628_s0 }
 0x605   :  { %v597_v52 = vpop.permute.xlu2 %596  ;;  %v558_v54 = vpop.permute.xlu1 %557 }
 0x606   :  { %v599_v57 = vadd.f32 %v597_v52, %v1856_v48  ;;  %v560_v58 = vadd.f32 %v558_v54, %v132_v55  ;;  %v601_v55 = vsub.f32 1.0, %v588_v47 }
 0x608   :  { %1479 = vtanh.f32 %v599_v57 }
 0x609   :  { %1481 = vtanh.f32 %v560_v58 }
 0x60e   :  { %v1480_v59 = vpop.eup %1479 }
 0x60f   :  { %v1482_v60 = vpop.eup %1481  ;;  %603 = vrot.lane.b32.xlu1 %v1480_v59, %s1629_s3 }
 0x610   :  { %564 = vrot.lane.b32.xlu0 %v1482_v60, %s1629_s3 }
 0x681   :  { %v604_v48 = vpop.permute.xlu1 %603 }
 0x682   :  { %v565_v53 = vpop.permute.xlu0 %564  ;;  %v606_v17 = vmul.f32 %v604_v48, %v601_v55 }
 0x683   :  { %v567_v7 = vmul.f32 %v565_v53, %v562_v61 }
 0x684   :  { %v1949_v20 = vadd.f32 %v607_v18, %v606_v17 }
 0x685   :  { %v1944_v56 = vadd.f32 %v568_v63, %v567_v7 }
 0x687   :  { %610 = vrot.lane.b32.xlu2 %v1944_v56, %s1629_s3 }
 0x6e1   :  { %v611_v21 = vpop.permute.xlu2 %610 }
 0x6e2   :  { %v613_v22 = vsel %vm356_vm10, %v611_v21, %v1949_v20 }
 0x6e3   :  { %1413 = vmatmul.msk.f32.vlgmr.msrb.gmra.mxu2 %vm228_vm11, %v613_v22  ;;  %1414 = vmatmul.msk.f32.vlgmr.msrb.gmra.mxu3 %vm228_vm11, %v613_v22 }
 0x6e4   :  { %1153 = vmatpush.msrb.mxu2 %v1677_v0  ;;  %1173 = vmatpush.msrb.mxu3 %v1682_v2 }
 0x6e6   :  { %1154 = vmatpush.msrb.mxu2 %v1679_v1  ;;  %1174 = vmatpush.msrb.mxu3 %v1687_v4  ;;  %v134_v4 = vpop.f32.mrf.mxu0 }
 0x6e8   :  { %1155 = vmatpush.msrb.mxu2 %v1684_v3  ;;  %1175 = vmatpush.msrb.mxu3 %v1690_v5  ;;  %v135_v5 = vadd.f32 %v134_v4, %v1860_v51 }
 0x6ea   :  { %1156 = vmatpush.msrb.mxu2 %v1692_v6  ;;  %1176 = vmatpush.msrb.mxu3 %v1699_v8 }
 0x6ec   :  { %1157 = vmatpush.msrb.mxu2 %v1701_v9  ;;  %1177 = vmatpush.msrb.mxu3 %v1705_v10 }
 0x6ee   :  { %1158 = vmatpush.msrb.mxu2 %v1707_v11  ;;  %1178 = vmatpush.msrb.mxu3 %v1711_v12 }
 0x6f0   :  { %1159 = vmatpush.msrb.mxu2 %v1713_v13  ;;  %1179 = vmatpush.msrb.mxu3 %v1719_v15 }
 0x6f2   :  { %1160 = vmatpush.msrb.mxu2 %v1717_v14  ;;  %1180 = vmatpush.msrb.mxu3 %v1726_v19 }
 0x766   :  { %v634_v0 = vpop.f32.mrf.mxu2  ;;  %v654_v1 = vpop.f32.mrf.mxu3 }
 0x767   :  { %v635_v2 = vadd.f32 %v634_v0, %v1840_v33  ;;  %v655_v3 = vadd.f32 %v654_v1, %v1844_v36 }
 0x769   :  { %719 = vrot.lane.b32.xlu1 %v655_v3, %s1628_s0  ;;  %680 = vrot.lane.b32.xlu0 %v635_v2, %s1628_s0  ;;  %v659_v6 = vadd.f32 %v635_v2, %v135_v5  ;;  %v698_v8 = vadd.f32 %v655_v3, %v1854_v46 }
 0x76b   :  { %v1415_v9 = vmul.f32 -1.442695, %v659_v6  ;;  %v1416_v10 = vmul.f32 -1.442695, %v698_v8 }
 0x76d   :  { %1483 = vpow2.f32 %v1415_v9 }
 0x76e   :  { %1485 = vpow2.f32 %v1416_v10 }
 0x773   :  { %v1484_v11 = vpop.eup %1483 }
 0x774   :  { %v1486_v12 = vpop.eup %1485  ;;  %v663_v13 = vadd.f32 1.0, %v1484_v11 }
 0x775   :  { %v702_v14 = vadd.f32 1.0, %v1486_v12 }
 0x776   :  { %1487 = vrcp.f32 %v663_v13  ;;  %vm669_vm0 = vweird.f32 %v663_v13  ;;  %v675_v50 = vand.u32 2147483648, %v663_v13  ;;  %v673_v38 = vand.u32 2147483647, %v663_v13 }
 0x777   :  { %1489 = vrcp.f32 %v702_v14  ;;  %v714_v34 = vand.u32 2147483648, %v702_v14  ;;  %vm708_vm1 = vweird.f32 %v702_v14  ;;  %v712_v37 = vand.u32 2147483647, %v702_v14 }
 0x778   :  { %v676_v45 = vor.u32 1.1754944e-38, %v675_v50  ;;  %vm674_vm5 = vcmp.eq.f32.partialorder %v673_v38, 8.507059e+37 }
 0x779   :  { %v715_v43 = vor.u32 1.1754944e-38, %v714_v34  ;;  %vm713_vm4 = vcmp.eq.f32.partialorder %v712_v37, 8.507059e+37 }
 0x77c   :  { %v1488_v15 = vpop.eup %1487 }
 0x77d   :  { %v1490_v19 = vpop.eup %1489  ;;  %v665_v24 = vmul.f32 %v1488_v15, %v663_v13  ;;  %vm670_vm14 = vweird.f32 %v1488_v15 }
 0x77e   :  { %v704_v23 = vmul.f32 %v1490_v19, %v702_v14  ;;  %vm709_vm15 = vweird.f32 %v1490_v19  ;;  %vm671_vm2 = vmor %vm669_vm0, %vm670_vm14 }
 0x77f   :  { %v666_v26 = vsub.f32 1.0, %v665_v24  ;;  %vm710_vm3 = vmor %vm708_vm1, %vm709_vm15 }
 0x780   :  { %v705_v25 = vsub.f32 1.0, %v704_v23 }
 0x781   :  { %v667_v28 = vmul.f32 %v1488_v15, %v666_v26 }
 0x782   :  { %v706_v27 = vmul.f32 %v1490_v19, %v705_v25 }
 0x783   :  { %v668_v31 = vadd.f32 %v1488_v15, %v667_v28 }
 0x784   :  { %v707_v30 = vadd.f32 %v1490_v19, %v706_v27 }
 0x785   :  { %v672_v41 = vsel %vm671_vm2, %v1488_v15, %v668_v31 }
 0x786   :  { %v711_v40 = vsel %vm710_vm3, %v1490_v19, %v707_v30  ;;  %v677_v54 = vsel %vm674_vm5, %v676_v45, %v672_v41 }
 0x787   :  { %v716_v49 = vsel %vm713_vm4, %v715_v43, %v711_v40  ;;  %v690_v48 = vsub.f32 1.0, %v677_v54  ;;  %v696_v17 = vmul.f32 %v677_v54, %v1944_v56 }
 0x788   :  { %v729_v0 = vsub.f32 1.0, %v716_v49  ;;  %v735_v2 = vmul.f32 %v716_v49, %v1949_v20 }
 0x7db   :  { %v720_v47 = vpop.permute.xlu1 %719  ;;  %v681_v52 = vpop.permute.xlu0 %680 }
 0x7dc   :  { %v722_v57 = vmul.f32 %v720_v47, %v716_v49  ;;  %v683_v58 = vmul.f32 %v681_v52, %v677_v54 }
 0x7de   :  { %724 = vrot.lane.b32.xlu0 %v722_v57, %s1628_s0  ;;  %685 = vrot.lane.b32.xlu2 %v683_v58, %s1628_s0 }
 0x838   :  { %v686_v59 = vpop.permute.xlu2 %685 }
 0x839   :  { %v688_v60 = vadd.f32 %v686_v59, %v135_v5  ;;  %v137_v5 = vpop.f32.mrf.mxu0 }
 0x83a   :  { %v138_v24 = vadd.f32 %v137_v5, %v1860_v51 }
 0x83b   :  { %1491 = vtanh.f32 %v688_v60 }
 0x841   :  { %v1492_v61 = vpop.eup %1491  ;;  %v1994_v6 = vpop.f32.mrf.mxu0 }
 0x842   :  { %692 = vrot.lane.b32.xlu1 %v1492_v61, %s1629_s3 }
 0x849   :  { %v1996_v8 = vpop.f32.mrf.mxu0 }
 0x850   :  { %v725_v53 = vpop.permute.xlu0 %724 }
 0x851   :  { %v727_v63 = vadd.f32 %v725_v53, %v1854_v46  ;;  %v1998_v9 = vpop.f32.mrf.mxu0 }
 0x853   :  { %1493 = vtanh.f32 %v727_v63 }
 0x859   :  { %v1494_v7 = vpop.eup %1493 }
 0x85a   :  { %731 = vrot.lane.b32.xlu2 %v1494_v7, %s1629_s3 }
 0x8b4   :  { %v693_v55 = vpop.permute.xlu1 %692  ;;  %v732_v22 = vpop.permute.xlu2 %731 }
 0x8b5   :  { %v695_v18 = vmul.f32 %v693_v55, %v690_v48  ;;  %v734_v1 = vmul.f32 %v732_v22, %v729_v0 }
 0x8b7   :  { %v1983_v21 = vadd.f32 %v696_v17, %v695_v18  ;;  %v1988_v46 = vadd.f32 %v735_v2, %v734_v1 }
 0x8b9   :  { %738 = vrot.lane.b32.xlu0 %v1983_v21, %s1629_s3 }
 0x92b   :  { %v739_v3 = vpop.permute.xlu0 %738 }
 0x92c   :  { %v741_v4 = vsel %vm356_vm10, %v739_v3, %v1988_v46 }
 0x92d   :  { %1417 = vmatmul.msk.f32.vlgmr.msrb.gmra.mxu0 %vm228_vm11, %v741_v4  ;;  %1418 = vmatmul.msk.f32.vlgmr.msrb.gmra.mxu1 %vm228_vm11, %v741_v4 }
 0x9aa   :  { %v762_v10 = vpop.f32.mrf.mxu0  ;;  %v782_v11 = vpop.f32.mrf.mxu1 }
 0x9ab   :  { %v763_v12 = vadd.f32 %v762_v10, %v1840_v33  ;;  %v783_v13 = vadd.f32 %v782_v11, %v1844_v36 }
 0x9ad   :  { %847 = vrot.lane.b32.xlu2 %v783_v13, %s1628_s0  ;;  %808 = vrot.lane.b32.xlu1 %v763_v12, %s1628_s0  ;;  %v826_v14 = vadd.f32 %v783_v13, %v1852_v44  ;;  %v787_v25 = vadd.f32 %v763_v12, %v138_v24 }
 0x9af   :  { %v1420_v15 = vmul.f32 -1.442695, %v826_v14  ;;  %v1419_v27 = vmul.f32 -1.442695, %v787_v25 }
 0x9b1   :  { %1495 = vpow2.f32 %v1420_v15 }
 0x9b7   :  { %v1496_v19 = vpop.eup %1495 }
 0x9b8   :  { %v830_v23 = vadd.f32 1.0, %v1496_v19 }
 0x9ba   :  { %1497 = vrcp.f32 %v830_v23  ;;  %v842_v38 = vand.u32 2147483648, %v830_v23  ;;  %vm836_vm7 = vweird.f32 %v830_v23  ;;  %v840_v40 = vand.u32 2147483647, %v830_v23 }
 0x9bb   :  { %1499 = vpow2.f32 %v1419_v27 }
 0x9bc   :  { %v843_v43 = vor.u32 1.1754944e-38, %v842_v38  ;;  %vm841_vm9 = vcmp.eq.f32.partialorder %v840_v40, 8.507059e+37 }
 0x9c0   :  { %v1498_v26 = vpop.eup %1497 }
 0x9c1   :  { %v832_v28 = vmul.f32 %v1498_v26, %v830_v23  ;;  %v1500_v31 = vpop.eup %1499  ;;  %vm837_vm6 = vweird.f32 %v1498_v26 }
 0x9c2   :  { %v791_v50 = vadd.f32 1.0, %v1500_v31  ;;  %vm838_vm8 = vmor %vm836_vm7, %vm837_vm6 }
 0x9c3   :  { %v833_v30 = vsub.f32 1.0, %v832_v28  ;;  %v141_v28 = vadd.f32 %v1994_v6, %v1860_v51 }
 0x9c4   :  { %1501 = vrcp.f32 %v791_v50  ;;  %v803_v60 = vand.u32 2147483648, %v791_v50  ;;  %vm797_vm13 = vweird.f32 %v791_v50  ;;  %v801_v61 = vand.u32 2147483647, %v791_v50 }
 0x9c5   :  { %v834_v34 = vmul.f32 %v1498_v26, %v833_v30 }
 0x9c6   :  { %v804_v63 = vor.u32 1.1754944e-38, %v803_v60  ;;  %vm802_vm15 = vcmp.eq.f32.partialorder %v801_v61, 8.507059e+37 }
 0x9c7   :  { %v835_v37 = vadd.f32 %v1498_v26, %v834_v34 }
 0x9c9   :  { %v839_v41 = vsel %vm838_vm8, %v1498_v26, %v835_v37 }
 0x9ca   :  { %v844_v47 = vsel %vm841_vm9, %v843_v43, %v839_v41  ;;  %v1502_v52 = vpop.eup %1501 }
 0x9cb   :  { %v793_v54 = vmul.f32 %v1502_v52, %v791_v50  ;;  %vm798_vm12 = vweird.f32 %v1502_v52  ;;  %v857_v12 = vsub.f32 1.0, %v844_v47  ;;  %v863_v14 = vmul.f32 %v844_v47, %v1988_v46 }
 0x9cc   :  { %vm799_vm14 = vmor %vm797_vm13, %vm798_vm12 }
 0x9cd   :  { %v794_v57 = vsub.f32 1.0, %v793_v54 }
 0x9cf   :  { %v795_v58 = vmul.f32 %v1502_v52, %v794_v57 }
 0x9d1   :  { %v796_v59 = vadd.f32 %v1502_v52, %v795_v58 }
 0x9d3   :  { %v800_v53 = vsel %vm799_vm14, %v1502_v52, %v796_v59 }
 0x9d4   :  { %v805_v48 = vsel %vm802_vm15, %v804_v63, %v800_v53 }
 0x9d5   :  { %v818_v3 = vsub.f32 1.0, %v805_v48  ;;  %v824_v5 = vmul.f32 %v805_v48, %v1983_v21 }
 0xa07   :  { %v848_v45 = vpop.permute.xlu2 %847 }
 0xa08   :  { %v850_v49 = vmul.f32 %v848_v45, %v844_v47 }
 0xa0a   :  { %852 = vrot.lane.b32.xlu1 %v850_v49, %s1628_s0 }
 0xa1f   :  { %v809_v7 = vpop.permute.xlu1 %808 }
 0xa20   :  { %v811_v55 = vmul.f32 %v809_v7, %v805_v48 }
 0xa22   :  { %813 = vrot.lane.b32.xlu0 %v811_v55, %s1628_s0 }
 0xa7c   :  { %v853_v17 = vpop.permute.xlu1 %852 }
 0xa7d   :  { %v855_v18 = vadd.f32 %v853_v17, %v1852_v44 }
 0xa7f   :  { %1503 = vtanh.f32 %v855_v18 }
 0xa85   :  { %v1504_v22 = vpop.eup %1503 }
 0xa86   :  { %859 = vrot.lane.b32.xlu0 %v1504_v22, %s1629_s3 }
 0xa94   :  { %v814_v0 = vpop.permute.xlu0 %813 }
 0xa95   :  { %v816_v1 = vadd.f32 %v814_v0, %v138_v24 }
 0xa97   :  { %1505 = vtanh.f32 %v816_v1 }
 0xa9d   :  { %v1506_v2 = vpop.eup %1505 }
 0xa9e   :  { %820 = vrot.lane.b32.xlu2 %v1506_v2, %s1629_s3 }
 0xaf8   :  { %v821_v4 = vpop.permute.xlu2 %820  ;;  %v860_v44 = vpop.permute.xlu0 %859 }
 0xaf9   :  { %v823_v10 = vmul.f32 %v821_v4, %v818_v3  ;;  %v862_v13 = vmul.f32 %v860_v44, %v857_v12 }
 0xafb   :  { %v2012_v11 = vadd.f32 %v824_v5, %v823_v10  ;;  %v2017_v15 = vadd.f32 %v863_v14, %v862_v13 }
 0xafd   :  { %870 = vrot.lane.b32.xlu1 %v2012_v11, %s1629_s3 }
 0xb6f   :  { %v871_v19 = vpop.permute.xlu1 %870 }
 0xb70   :  { %v873_v23 = vsel %vm356_vm10, %v871_v19, %v2017_v15 }
 0xb71   :  { %1421 = vmatmul.msk.f32.vlgmr.msra.gmra.mxu2 %vm228_vm11, %v873_v23  ;;  %1422 = vmatmul.msk.f32.vlgmr.msra.gmra.mxu3 %vm228_vm11, %v873_v23 }
 0xbf4   :  { %v894_v24 = vpop.f32.mrf.mxu2  ;;  %v914_v25 = vpop.f32.mrf.mxu3 }
 0xbf5   :  { %v895_v26 = vadd.f32 %v894_v24, %v1840_v33  ;;  %v915_v27 = vadd.f32 %v914_v25, %v1844_v36 }
 0xbf7   :  { %979 = vrot.lane.b32.xlu0 %v915_v27, %s1628_s0  ;;  %940 = vrot.lane.b32.xlu2 %v895_v26, %s1628_s0  ;;  %v919_v30 = vadd.f32 %v895_v26, %v141_v28  ;;  %v958_v37 = vadd.f32 %v915_v27, %v1850_v42 }
 0xbf9   :  { %v1423_v31 = vmul.f32 -1.442695, %v919_v30  ;;  %v1424_v40 = vmul.f32 -1.442695, %v958_v37 }
 0xbfb   :  { %1507 = vpow2.f32 %v1423_v31 }
 0xc01   :  { %v1508_v34 = vpop.eup %1507 }
 0xc02   :  { %v923_v50 = vadd.f32 1.0, %v1508_v34 }
 0xc04   :  { %1509 = vrcp.f32 %v923_v50  ;;  %v935_v54 = vand.u32 2147483648, %v923_v50  ;;  %vm929_vm1 = vweird.f32 %v923_v50  ;;  %v933_v6 = vand.u32 2147483647, %v923_v50 }
 0xc05   :  { %1511 = vpow2.f32 %v1424_v40 }
 0xc06   :  { %v936_v58 = vor.u32 1.1754944e-38, %v935_v54  ;;  %vm934_vm3 = vcmp.eq.f32.partialorder %v933_v6, 8.507059e+37 }
 0xc0a   :  { %v1510_v38 = vpop.eup %1509 }
 0xc0b   :  { %v925_v41 = vmul.f32 %v1510_v38, %v923_v50  ;;  %v1512_v45 = vpop.eup %1511  ;;  %vm930_vm0 = vweird.f32 %v1510_v38 }
 0xc0c   :  { %v962_v49 = vadd.f32 1.0, %v1512_v45  ;;  %vm931_vm2 = vmor %vm929_vm1, %vm930_vm0 }
 0xc0d   :  { %v926_v43 = vsub.f32 1.0, %v925_v41  ;;  %v144_v41 = vadd.f32 %v1996_v8, %v1860_v51 }
 0xc0e   :  { %1513 = vrcp.f32 %v962_v49  ;;  %v974_v17 = vand.u32 2147483648, %v962_v49  ;;  %vm968_vm5 = vweird.f32 %v962_v49  ;;  %v972_v18 = vand.u32 2147483647, %v962_v49 }
 0xc0f   :  { %v927_v47 = vmul.f32 %v1510_v38, %v926_v43 }
 0xc10   :  { %v975_v0 = vor.u32 1.1754944e-38, %v974_v17  ;;  %vm973_vm7 = vcmp.eq.f32.partialorder %v972_v18, 8.507059e+37 }
 0xc11   :  { %v928_v52 = vadd.f32 %v1510_v38, %v927_v47 }
 0xc13   :  { %v932_v57 = vsel %vm931_vm2, %v1510_v38, %v928_v52 }
 0xc14   :  { %v937_v60 = vsel %vm934_vm3, %v936_v58, %v932_v57  ;;  %v1514_v53 = vpop.eup %1513 }
 0xc15   :  { %v964_v63 = vmul.f32 %v1514_v53, %v962_v49  ;;  %vm969_vm4 = vweird.f32 %v1514_v53  ;;  %v950_v14 = vsub.f32 1.0, %v937_v60  ;;  %v956_v23 = vmul.f32 %v937_v60, %v2012_v11 }
 0xc16   :  { %vm970_vm6 = vmor %vm968_vm5, %vm969_vm4 }
 0xc17   :  { %v965_v7 = vsub.f32 1.0, %v964_v63 }
 0xc19   :  { %v966_v48 = vmul.f32 %v1514_v53, %v965_v7 }
 0xc1b   :  { %v967_v55 = vadd.f32 %v1514_v53, %v966_v48 }
 0xc1d   :  { %v971_v22 = vsel %vm970_vm6, %v1514_v53, %v967_v55 }
 0xc1e   :  { %v976_v2 = vsel %vm973_vm7, %v975_v0, %v971_v22 }
 0xc1f   :  { %v989_v26 = vsub.f32 1.0, %v976_v2 }
 0xc51   :  { %v941_v59 = vpop.permute.xlu2 %940 }
 0xc52   :  { %v943_v61 = vmul.f32 %v941_v59, %v937_v60 }
 0xc54   :  { %945 = vrot.lane.b32.xlu1 %v943_v61, %s1628_s0 }
 0xc69   :  { %v980_v1 = vpop.permute.xlu0 %979 }
 0xc6a   :  { %v982_v3 = vmul.f32 %v980_v1, %v976_v2 }
 0xc6c   :  { %984 = vrot.lane.b32.xlu2 %v982_v3, %s1628_s0 }
 0xcc6   :  { %v985_v4 = vpop.permute.xlu2 %984  ;;  %v946_v5 = vpop.permute.xlu1 %945 }
 0xcc7   :  { %v987_v10 = vadd.f32 %v985_v4, %v1850_v42  ;;  %v948_v44 = vadd.f32 %v946_v5, %v141_v28  ;;  %v995_v28 = vmul.f32 %v976_v2, %v2017_v15 }
 0xcc9   :  { %1515 = vtanh.f32 %v987_v10 }
 0xcca   :  { %1517 = vtanh.f32 %v948_v44 }
 0xccf   :  { %v1516_v12 = vpop.eup %1515 }
 0xcd0   :  { %v1518_v13 = vpop.eup %1517  ;;  %991 = vrot.lane.b32.xlu1 %v1516_v12, %s1629_s3 }
 0xcd1   :  { %952 = vrot.lane.b32.xlu0 %v1518_v13, %s1629_s3 }
 0xd42   :  { %v992_v42 = vpop.permute.xlu1 %991 }
 0xd43   :  { %v953_v19 = vpop.permute.xlu0 %952  ;;  %v994_v27 = vmul.f32 %v992_v42, %v989_v26 }
 0xd44   :  { %v955_v24 = vmul.f32 %v953_v19, %v950_v14 }
 0xd45   :  { %v2041_v30 = vadd.f32 %v995_v28, %v994_v27 }
 0xd46   :  { %v2036_v25 = vadd.f32 %v956_v23, %v955_v24 }
 0xd48   :  { %1004 = vrot.lane.b32.xlu2 %v2036_v25, %s1629_s3 }
 0xda2   :  { %v1005_v31 = vpop.permute.xlu2 %1004 }
 0xda3   :  { %v1007_v34 = vsel %vm356_vm10, %v1005_v31, %v2041_v30 }
 0xda4   :  { %1425 = vmatmul.msk.f32.vlgmr.msra.gmra.mxu0 %vm228_vm11, %v1007_v34  ;;  %1426 = vmatmul.msk.f32.vlgmr.msra.gmra.mxu1 %vm228_vm11, %v1007_v34 }
 0xe21   :  { %v1028_v50 = vpop.f32.mrf.mxu0  ;;  %v1048_v37 = vpop.f32.mrf.mxu1 }
 0xe22   :  { %v1029_v38 = vadd.f32 %v1028_v50, %v1840_v33  ;;  %v1049_v40 = vadd.f32 %v1048_v37, %v1844_v36 }
 0xe24   :  { %1113 = vrot.lane.b32.xlu1 %v1049_v40, %s1628_s0  ;;  %1074 = vrot.lane.b32.xlu0 %v1029_v38, %s1628_s0  ;;  %v1053_v43 = vadd.f32 %v1029_v38, %v144_v41  ;;  %v1092_v45 = vadd.f32 %v1049_v40, %v1846_v39 }
 0xe26   :  { %v1427_v47 = vmul.f32 -1.442695, %v1053_v43  ;;  %v1428_v49 = vmul.f32 -1.442695, %v1092_v45 }
 0xe28   :  { %1519 = vpow2.f32 %v1427_v47 }
 0xe29   :  { %1521 = vpow2.f32 %v1428_v49 }
 0xe2e   :  { %v1520_v52 = vpop.eup %1519 }
 0xe2f   :  { %v1522_v54 = vpop.eup %1521  ;;  %v1057_v6 = vadd.f32 1.0, %v1520_v52 }
 0xe30   :  { %v1096_v57 = vadd.f32 1.0, %v1522_v54 }
 0xe31   :  { %1523 = vrcp.f32 %v1057_v6  ;;  %vm1063_vm12 = vweird.f32 %v1057_v6  ;;  %v1069_v18 = vand.u32 2147483648, %v1057_v6  ;;  %v1067_v0 = vand.u32 2147483647, %v1057_v6 }
 0xe32   :  { %1525 = vrcp.f32 %v1096_v57  ;;  %v1108_v17 = vand.u32 2147483648, %v1096_v57  ;;  %vm1102_vm13 = vweird.f32 %v1096_v57  ;;  %v1106_v22 = vand.u32 2147483647, %v1096_v57 }
 0xe33   :  { %v1070_v4 = vor.u32 1.1754944e-38, %v1069_v18  ;;  %vm1068_vm1 = vcmp.eq.f32.partialorder %v1067_v0, 8.507059e+37 }
 0xe34   :  { %v1109_v3 = vor.u32 1.1754944e-38, %v1108_v17  ;;  %vm1107_vm0 = vcmp.eq.f32.partialorder %v1106_v22, 8.507059e+37 }
 0xe37   :  { %v1524_v58 = vpop.eup %1523 }
 0xe38   :  { %v1526_v59 = vpop.eup %1525  ;;  %v1059_v61 = vmul.f32 %v1524_v58, %v1057_v6  ;;  %vm1064_vm8 = vweird.f32 %v1524_v58 }
 0xe39   :  { %v1098_v60 = vmul.f32 %v1526_v59, %v1096_v57  ;;  %vm1103_vm9 = vweird.f32 %v1526_v59  ;;  %vm1065_vm14 = vmor %vm1063_vm12, %vm1064_vm8 }
 0xe3a   :  { %v1060_v63 = vsub.f32 1.0, %v1059_v61  ;;  %vm1104_vm15 = vmor %vm1102_vm13, %vm1103_vm9  ;;  %v147_v61 = vadd.f32 %v1998_v9, %v1860_v51 }
 0xe3b   :  { %v1099_v53 = vsub.f32 1.0, %v1098_v60 }
 0xe3c   :  { %v1061_v7 = vmul.f32 %v1524_v58, %v1060_v63 }
 0xe3d   :  { %v1100_v8 = vmul.f32 %v1526_v59, %v1099_v53 }
 0xe3e   :  { %v1062_v55 = vadd.f32 %v1524_v58, %v1061_v7 }
 0xe3f   :  { %v1101_v48 = vadd.f32 %v1526_v59, %v1100_v8 }
 0xe40   :  { %v1066_v2 = vsel %vm1065_vm14, %v1524_v58, %v1062_v55 }
 0xe41   :  { %v1105_v1 = vsel %vm1104_vm15, %v1526_v59, %v1101_v48  ;;  %v1071_v12 = vsel %vm1068_vm1, %v1070_v4, %v1066_v2 }
 0xe42   :  { %v1110_v10 = vsel %vm1107_vm0, %v1109_v3, %v1105_v1  ;;  %v1084_v28 = vsub.f32 1.0, %v1071_v12  ;;  %v1090_v34 = vmul.f32 %v1071_v12, %v2036_v25 }
 0xe43   :  { %v1123_v40 = vsub.f32 1.0, %v1110_v10  ;;  %v1129_v43 = vmul.f32 %v1110_v10, %v2041_v30 }
 0xe96   :  { %v1114_v5 = vpop.permute.xlu1 %1113  ;;  %v1075_v44 = vpop.permute.xlu0 %1074 }
 0xe97   :  { %v1116_v13 = vmul.f32 %v1114_v5, %v1110_v10  ;;  %v1077_v14 = vmul.f32 %v1075_v44, %v1071_v12 }
 0xe99   :  { %1118 = vrot.lane.b32.xlu0 %v1116_v13, %s1628_s0  ;;  %1079 = vrot.lane.b32.xlu2 %v1077_v14, %s1628_s0 }
 0xef3   :  { %v1080_v19 = vpop.permute.xlu2 %1079 }
 0xef4   :  { %v1082_v23 = vadd.f32 %v1080_v19, %v144_v41 }
 0xef6   :  { %1527 = vtanh.f32 %v1082_v23 }
 0xefc   :  { %v1528_v24 = vpop.eup %1527 }
 0xefd   :  { %1086 = vrot.lane.b32.xlu1 %v1528_v24, %s1629_s3 }
 0xf0b   :  { %v1119_v42 = vpop.permute.xlu0 %1118 }
 0xf0c   :  { %v1121_v26 = vadd.f32 %v1119_v42, %v1846_v39 }
 0xf0e   :  { %1529 = vtanh.f32 %v1121_v26 }
 0xf14   :  { %v1530_v27 = vpop.eup %1529 }
 0xf15   :  { %1125 = vrot.lane.b32.xlu2 %v1530_v27, %s1629_s3 }
 0xf6f   :  { %v1087_v31 = vpop.permute.xlu1 %1086  ;;  %v1126_v38 = vpop.permute.xlu2 %1125 }
 0xf70   :  { %v1089_v50 = vmul.f32 %v1087_v31, %v1084_v28  ;;  %v1128_v41 = vmul.f32 %v1126_v38, %v1123_v40  ;;  %v1276_v38 = vld [vmem:[#allocation6 + $0x18] sm:$0xff]  ;;  %v1275_v40 = vld [vmem:[#allocation6 + $0x10] sm:$0xff] }
 0xf71   :  { %1323 = vmatpush.msrb.mxu1 %v1276_v38 }
 0xf72   :  { %v2060_v37 = vadd.f32 %v1090_v34, %v1089_v50  ;;  %v2065_v39 = vadd.f32 %v1129_v43, %v1128_v41  ;;  %v1274_v41 = vld [vmem:[#allocation6 + $0x8] sm:$0xff]  ;;  %v1273_v43 = vld [vmem:[#allocation6] sm:$0xff] }
 0xf73   :  { %1324 = vmatpush.msrb.mxu1 %v1275_v40 }
 0xf74   :  { %1138 = vrot.lane.b32.xlu0 %v2060_v37, %s1629_s3 }
 0xf75   :  { %1325 = vmatpush.msrb.mxu1 %v1274_v41 }
 0xf77   :  { %1326 = vmatpush.msrb.mxu1 %v1273_v43 }
 0xfe6   :  { %v1139_v45 = vpop.permute.xlu0 %1138 }
 0xfe7   :  { %v1141_v47 = vsel %vm356_vm10, %v1139_v45, %v2065_v39  ;;  %v866_v45 = vadd.f32 %v2017_v15, %v1983_v21 }
 0xfe8   :  { %1429 = vmatmul.msk.f32.vlgmr.msrb.gmra.mxu2 %vm228_vm11, %v1141_v47  ;;  %1430 = vmatmul.msk.f32.vlgmr.msrb.gmra.mxu3 %vm228_vm11, %v1141_v47  ;;  %v997_v47 = vadd.f32 %v2036_v25, %v1949_v20 }
0x106b   :  { %v1162_v49 = vpop.f32.mrf.mxu2  ;;  %v1182_v52 = vpop.f32.mrf.mxu3 }
0x106c   :  { %v1163_v54 = vadd.f32 %v1162_v49, %v1840_v33  ;;  %v1183_v6 = vadd.f32 %v1182_v52, %v1844_v36 }
0x106e   :  { %1247 = vrot.lane.b32.xlu2 %v1183_v6, %s1628_s0  ;;  %1208 = vrot.lane.b32.xlu1 %v1163_v54, %s1628_s0  ;;  %v1226_v57 = vadd.f32 %v1183_v6, %v1838_v32  ;;  %v1187_v53 = vadd.f32 %v1163_v54, %v147_v61 }
0x1070   :  { %v1432_v58 = vmul.f32 -1.442695, %v1226_v57  ;;  %v1431_v8 = vmul.f32 -1.442695, %v1187_v53  ;;  %v1000_v57 = vadd.f32 %v2041_v30, %v1944_v56  ;;  %v1134_v56 = vadd.f32 %v2065_v39, %v1905_v35  ;;  %v1280_v35 = vld [vmem:[#allocation6 + $0x38] sm:$0xff] }
0x1071   :  { %1298 = vmatpush.msrb.mxu0 %v1280_v35 }
0x1072   :  { %1531 = vpow2.f32 %v1432_v58  ;;  %v1131_v58 = vadd.f32 %v2060_v37, %v1910_v29 }
0x1078   :  { %v1532_v59 = vpop.eup %1531 }
0x1079   :  { %v1230_v60 = vadd.f32 1.0, %v1532_v59 }
0x107b   :  { %1533 = vrcp.f32 %v1230_v60  ;;  %v1242_v18 = vand.u32 2147483648, %v1230_v60  ;;  %vm1236_vm2 = vweird.f32 %v1230_v60  ;;  %v1240_v22 = vand.u32 2147483647, %v1230_v60 }
0x107c   :  { %1535 = vpow2.f32 %v1431_v8 }
0x107d   :  { %v1243_v1 = vor.u32 1.1754944e-38, %v1242_v18  ;;  %vm1241_vm4 = vcmp.eq.f32.partialorder %v1240_v22, 8.507059e+37 }
0x1081   :  { %v1534_v63 = vpop.eup %1533 }
0x1082   :  { %v1232_v33 = vmul.f32 %v1534_v63, %v1230_v60  ;;  %v1536_v7 = vpop.eup %1535  ;;  %vm1237_vm11 = vweird.f32 %v1534_v63 }
0x1083   :  { %v1191_v55 = vadd.f32 1.0, %v1536_v7  ;;  %vm1238_vm3 = vmor %vm1236_vm2, %vm1237_vm11 }
0x1084   :  { %v1233_v36 = vsub.f32 1.0, %v1232_v33 }
0x1085   :  { %1537 = vrcp.f32 %v1191_v55  ;;  %v1203_v12 = vand.u32 2147483648, %v1191_v55  ;;  %vm1197_vm6 = vweird.f32 %v1191_v55  ;;  %v1201_v13 = vand.u32 2147483647, %v1191_v55 }
0x1086   :  { %v1234_v48 = vmul.f32 %v1534_v63, %v1233_v36 }
0x1087   :  { %v1204_v19 = vor.u32 1.1754944e-38, %v1203_v12  ;;  %vm1202_vm8 = vcmp.eq.f32.partialorder %v1201_v13, 8.507059e+37  ;;  %v1446_v13 = vld [vmem:[%s2117_s6] ss:$0 sm:$0xff] }
0x1088   :  { %v1235_v17 = vadd.f32 %v1534_v63, %v1234_v48 }
0x108a   :  { %v1239_v0 = vsel %vm1238_vm3, %v1534_v63, %v1235_v17 }
0x108b   :  { %v1244_v9 = vsel %vm1241_vm4, %v1243_v1, %v1239_v0  ;;  %v1538_v3 = vpop.eup %1537  ;;  %v1277_v1 = vld [vmem:[#allocation6 + $0x20] sm:$0xff] }
0x108c   :  { %v1193_v4 = vmul.f32 %v1538_v3, %v1191_v55  ;;  %vm1198_vm5 = vweird.f32 %v1538_v3  ;;  %v1263_v63 = vmul.f32 %v1244_v9, %v2065_v39  ;;  %v1279_v39 = vld [vmem:[#allocation6 + $0x30] sm:$0xff] }
0x108d   :  { %vm1199_vm7 = vmor %vm1197_vm6, %vm1198_vm5  ;;  %1299 = vmatpush.msrb.mxu0 %v1279_v39 }
0x108e   :  { %v1194_v5 = vsub.f32 1.0, %v1193_v4 }
0x1090   :  { %v1195_v10 = vmul.f32 %v1538_v3, %v1194_v5 }
0x1092   :  { %v1196_v44 = vadd.f32 %v1538_v3, %v1195_v10 }
0x1094   :  { %v1200_v14 = vsel %vm1199_vm7, %v1538_v3, %v1196_v44  ;;  %v1331_v3 = vld [vmem:[#allocation6 + $0x40] sm:$0xff] }
0x1095   :  { %v1205_v24 = vsel %vm1202_vm8, %v1204_v19, %v1200_v14 }
0x1096   :  { %v1224_v20 = vmul.f32 %v1205_v24, %v2060_v37 }
0x10c8   :  { %v1248_v51 = vpop.permute.xlu2 %1247 }
0x10c9   :  { %v1250_v2 = vmul.f32 %v1248_v51, %v1244_v9  ;;  %v1333_v51 = vld [vmem:[#allocation6 + $0x50] sm:$0xff] }
0x10cb   :  { %1252 = vrot.lane.b32.xlu1 %v1250_v2, %s1628_s0 }
0x10e0   :  { %v1209_v23 = vpop.permute.xlu1 %1208 }
0x10e1   :  { %v1211_v42 = vmul.f32 %v1209_v23, %v1205_v24 }
0x10e3   :  { %1213 = vrot.lane.b32.xlu0 %v1211_v42, %s1628_s0 }
0x113d   :  { %v1253_v26 = vpop.permute.xlu1 %1252 }
0x113e   :  { %v1255_v27 = vadd.f32 %v1253_v26, %v1838_v32  ;;  %v865_v32 = vadd.f32 %v2012_v11, %v1988_v46  ;;  %v1218_v46 = vsub.f32 1.0, %v1205_v24  ;;  %v1257_v11 = vsub.f32 1.0, %v1244_v9  ;;  %v1332_v9 = vld [vmem:[#allocation6 + $0x48] sm:$0xff] }
0x1140   :  { %1539 = vtanh.f32 %v1255_v27  ;;  %v867_v49 = vmax.f32 %v865_v32, %v866_v45  ;;  %v868_v52 = vadd.f32 %v866_v45, %v865_v32 }
0x1142   :  { %v998_v54 = vmax.f32 %v867_v49, %v997_v47  ;;  %v999_v6 = vadd.f32 %v997_v47, %v868_v52 }
0x1144   :  { %v1001_v59 = vmax.f32 %v998_v54, %v1000_v57  ;;  %v1002_v60 = vadd.f32 %v1000_v57, %v999_v6 }
0x1146   :  { %v1540_v28 = vpop.eup %1539  ;;  %v1133_v21 = vadd.f32 %v1131_v58, %v1002_v60 }
0x1147   :  { %1259 = vrot.lane.b32.xlu0 %v1540_v28, %s1629_s3 }
0x1148   :  { %v1136_v48 = vadd.f32 %v1134_v56, %v1133_v21 }
0x1155   :  { %v1214_v31 = vpop.permute.xlu0 %1213 }
0x1156   :  { %v1216_v34 = vadd.f32 %v1214_v31, %v147_v61  ;;  %v1132_v61 = vmax.f32 %v1001_v59, %v1131_v58 }
0x1158   :  { %1541 = vtanh.f32 %v1216_v34  ;;  %v1135_v7 = vmax.f32 %v1132_v61, %v1134_v56 }
0x115e   :  { %v1542_v50 = vpop.eup %1541 }
0x115f   :  { %1220 = vrot.lane.b32.xlu2 %v1542_v50, %s1629_s3 }
0x11b9   :  { %v1221_v15 = vpop.permute.xlu2 %1220  ;;  %v1260_v53 = vpop.permute.xlu0 %1259 }
0x11ba   :  { %v1223_v25 = vmul.f32 %v1221_v15, %v1218_v46  ;;  %v1262_v8 = vmul.f32 %v1260_v53, %v1257_v11 }
0x11bc   :  { %v1225_v30 = vadd.f32 %v1224_v20, %v1223_v25  ;;  %v1264_v33 = vadd.f32 %v1263_v63, %v1262_v8 }
0x11be   :  { %v1265_v29 = vadd.f32 %v1225_v30, %v1871_v16  ;;  %v1271_v36 = vadd.f32 %v1264_v33, %v1225_v30  ;;  %v1268_v55 = vadd.f32 %v1264_v33, %v1867_v62  ;;  %v1278_v16 = vld [vmem:[#allocation6 + $0x28] sm:$0xff]  ;;  %v1334_v62 = vld [vmem:[#allocation6 + $0x58] sm:$0xff] }
0x11bf   :  { %1300 = vmatpush.msrb.mxu0 %v1278_v16 }
0x11c0   :  { %1307 = vrot.lane.b32.xlu2 %v1271_v36, %s1629_s3  ;;  %v1266_v17 = vmax.f32 %v1135_v7, %v1265_v29  ;;  %v1267_v37 = vadd.f32 %v1265_v29, %v1136_v48 }
0x11c1   :  { %1301 = vmatpush.msrb.mxu0 %v1277_v1 }
0x11c2   :  { %v1269_v18 = vmax.f32 %v1266_v17, %v1268_v55  ;;  %v1270_v22 = vadd.f32 %v1268_v55, %v1267_v37 }
0x11c3   :  { %1352 = vmatpush.msra.mxu0 %v1334_v62 }
0x11c4   :  { %1282 = vrot.lane.b32.xlu1 %v1269_v18, %s1629_s3  ;;  %v1272_v0 = vmul.f32 0.125, %v1270_v22 }
0x11c5   :  { %1353 = vmatpush.msra.mxu0 %v1333_v51 }
0x11c6   :  { %1336 = vrot.lane.b32.xlu0 %v1272_v0, %s1629_s3 }
0x11c7   :  { %1354 = vmatpush.msra.mxu0 %v1332_v9 }
0x11c9   :  { %1355 = vmatpush.msra.mxu0 %v1331_v3 }
0x121a   :  { %v1308_v2 = vpop.permute.xlu2 %1307 }
0x121b   :  { %1434 = vmatmul.msk.f32.vlgmr.msrb.gmra.mxu1 %vm356_vm10, %v1308_v2 }
0x1236   :  { %v1283_v4 = vpop.permute.xlu1 %1282 }
0x1237   :  { %1433 = vmatmul.msk.f32.vlgmr.msrb.gmra.mxu0 %vm356_vm10, %v1283_v4 }
0x1238   :  { %v1337_v5 = vpop.permute.xlu0 %1336 }
0x123f   :  { %1435 = vmatmul.msk.f32.vlgmr.msra.gmra.mxu0 %vm356_vm10, %v1337_v5 }
0x1298   :  { %v1328_v44 = vpop.f32.mrf.mxu1 }
0x12b4   :  { %v1303_v10 = vpop.f32.mrf.mxu0 }
0x12b5   :  { %v1329_v12 = vadd.f32 %v1328_v44, %v1303_v10 }
0x12bc   :  { %v1357_v14 = vpop.f32.mrf.mxu0 }
0x12bd   :  { %v1360_v19 = vadd.f32 %v1357_v14, %v1329_v12 }
0x12bf   :  { %v1365_v23 = vadd.f32 %v1446_v13, %v1360_v19 }
0x12c1   :  { %1366 = vst [vmem:[#allocation8] sm:$0xff] %v1365_v23 }
0x12c2   :  { %1377 = dma.vmem_to_hbm [thread:$0]  %s1373_s13, 128, %s1375_s5, [#allocation5]  }
0x12c3   :  { %1619 = dma.done.wait [#allocation5], 128  }
0x12c4   :  { %1620 = vsyncadd [#allocation5], 4294967168 }
0x12c5   :  { %1382 = vsyncpa [#allocation4], 1 }
0x12c6   :  { %1383 = vsyncpa [#allocation7], 1 }
0x12c7   :  { %1384 = vsyncpa [#allocation5], 1 }

</bundles_post_ra>
